<compile_context>
chip_gen: v6e
topology: v6e:2x2x1
jax: 0.10.0
libtpu: 0.0.40
codegen_flags: <defaults>
</compile_context>

<pallas_src>
import math
import functools
import numpy as np
import jax
import jax.numpy as jnp
from jax.experimental import pallas as pl
from jax.experimental.pallas import tpu as pltpu

# ---------------- static configuration (module hyper-params) ----------------
N_NODES = 8
N_EDGES = 16
IN_DIM = 32          # in_hid
OUT_DIM = 32         # out_hid
NUM_TYPES = 2
NUM_RELATIONS = 2
N_HEADS = 4
D_K = OUT_DIM // N_HEADS
SQRT_DK = math.sqrt(D_K)

# HGT skip connection does alpha*W*h + (1-alpha)*x, so in_dim must equal out_dim.
assert IN_DIM == OUT_DIM, "HGTConv skip connection requires in_dim == out_dim"

_FAST = jax.lax.Precision.DEFAULT    # single-pass bf16 MXU, f32 accumulation
_EXACT = jax.lax.Precision.HIGHEST   # only used for {0,1} x {0,1} composition on XLA side

# node_pack lane layout: [x_aug | ab_skip | ant | sp_map | tgt_oh_T]
X_AUG_LANES = NUM_TYPES * IN_DIM + NUM_TYPES                 # 66
NODE_FEAT_LANES = X_AUG_LANES + OUT_DIM + NUM_TYPES          # 100


def _erf(x):
    # Abramowitz & Stegun 7.1.26 rational approximation (|err| < 1.5e-7),
    # built only from exp / mul / add so it lowers cleanly in Mosaic.
    a1, a2, a3, a4, a5 = 0.254829592, -0.284496736, 1.421413741, -1.453152027, 1.061405429
    p = 0.3275911
    s = jnp.where(x >= 0.0, 1.0, -1.0)
    ax = jnp.abs(x)
    t = 1.0 / (1.0 + p * ax)
    poly = ((((a5 * t + a4) * t + a3) * t + a2) * t + a1) * t
    return s * (1.0 - poly * jnp.exp(-ax * ax))


def _gelu_exact(x):
    # matches torch.nn.functional.gelu (erf form) up to ~1.5e-7
    return 0.5 * x * (1.0 + _erf(x * (1.0 / math.sqrt(2.0))))


# ------------------------------- kernel -------------------------------------
def _hgt_kernel(node_ref, edge_ref, wkvqs_ref, rel_ref, misc_ref, out_ref):
    Nb = node_ref.shape[0]          # nodes per block (graphs_per_block * N)
    Eb = edge_ref.shape[0]          # edges per block (graphs_per_block * E)
    T, R, H, OUT = NUM_TYPES, NUM_RELATIONS, N_HEADS, OUT_DIM

    def mm(a, b):   # one bf16 MXU pass, f32 accumulate
        return jnp.dot(a, b, preferred_element_type=jnp.float32, precision=_FAST)

    # ---- static lane slices of the packed per-block inputs ----
    x_aug    = node_ref[:, 0:X_AUG_LANES]                                   # (Nb, T*IN+T)
    ab_skip  = node_ref[:, X_AUG_LANES:X_AUG_LANES + OUT]                   # alpha*a_b + (1-alpha)*x
    ant      = node_ref[:, X_AUG_LANES + OUT:X_AUG_LANES + OUT + T]         # alpha * node-type one-hot
    sp_map   = node_ref[:, NODE_FEAT_LANES:NODE_FEAT_LANES + Nb]            # (Nb, Nb)
    tgt_oh_T = node_ref[:, NODE_FEAT_LANES + Nb:NODE_FEAT_LANES + Nb + Eb]  # (Nb, Eb)

    tgt_oh = edge_ref[:, R * Nb:(R + 1) * Nb]                               # (Eb, Nb)
    pri_s  = edge_ref[:, (R + 1) * Nb:(R + 1) * Nb + H]                     # (Eb, H) relation_pri/sqrt(dk)

    w_a       = misc_ref[0:OUT, 0:T * OUT]                                  # (OUT, T*OUT), lane offset 0
    head_oh   = misc_ref[0:OUT, T * OUT:T * OUT + H]                        # (OUT, H)
    head_oh_T = misc_ref[OUT:OUT + H, 0:OUT]                                # (H, OUT)

    # ---- fused K|V|Q|speaker projection (+ biases) for every node: ONE MXU pass ----
    kvqs_n = mm(x_aug, wkvqs_ref[...])                                      # (Nb, 4*OUT) = [K|V|Q|S]
    kv_n = kvqs_n[:, :2 * OUT]
    q_n  = kvqs_n[:, 2 * OUT:3 * OUT]
    s_n  = kvqs_n[:, 3 * OUT:4 * OUT]                                       # x @ (v_w[1]@s2u) + b_s2u

    # ---- relation transform at NODE granularity, all relations in one matmul ----
    kvrot_wide = mm(kv_n, rel_ref[...])                                     # (Nb, R*2*OUT)

    # ---- relation-masked source gathers: fuses src gather + relation dispatch ----
    kvrot_e = mm(edge_ref[:, 0:Nb], kvrot_wide[:, 0:2 * OUT])               # (Eb, 2*OUT)
    for r in range(1, R):
        kvrot_e = kvrot_e + mm(edge_ref[:, r * Nb:(r + 1) * Nb],
                               kvrot_wide[:, r * 2 * OUT:(r + 1) * 2 * OUT])
    k_rot = kvrot_e[:, :OUT]                                                # K . relation_att
    msg_e = kvrot_e[:, OUT:2 * OUT]                                         # V . relation_msg
    q_e = mm(tgt_oh, q_n)                                                   # (Eb, OUT) target Q

    # ---- per-head attention logits ----
    logits = mm(q_e * k_rot, head_oh) * pri_s                               # (Eb, H)

    # ---- numerically-stable softmax per (target node, head) over incoming edges ----
    cols = []
    for h in range(H):
        lh = logits[:, h:h + 1]                                             # (Eb, 1)
        seg_max = jnp.max(jnp.where(tgt_oh > 0.5, lh, -1e30),
                          axis=0, keepdims=True)                            # (1, Nb)
        gmax = jnp.sum(tgt_oh * seg_max, axis=1, keepdims=True)             # (Eb, 1)
        cols.append(lh - gmax)
    p = jnp.exp(jnp.concatenate(cols, axis=1))                              # (Eb, H)
    seg_sum = mm(tgt_oh_T, p)                                               # (Nb, H) segment sums (MXU)
    g_sum   = mm(tgt_oh, seg_sum)                                           # (Eb, H)
    att = p * pl.reciprocal(g_sum + 1e-16, approx=True)                     # PyG softmax semantics

    # ---- weighted messages + aggr='add' scatter onto target nodes ----
    res_e = msg_e * mm(att, head_oh_T)                                      # (Eb, OUT)
    aggr  = mm(tgt_oh_T, res_e)                                             # (Nb, OUT)

    # ---- speaker information: last-write-wins scatter precomputed as sp_map ----
    sp_info = mm(sp_map, s_n)                                               # (Nb, OUT)

    h_n = _gelu_exact(aggr + sp_info)

    # ---- Step 3: target-specific aggregation with learnable skip (one matmul) ----
    a_both = mm(h_n, w_a)                                                   # (Nb, T*OUT)
    out = ab_skip
    for t in range(T):
        out = out + ant[:, t:t + 1] * a_both[:, t * OUT:(t + 1) * OUT]
    out_ref[...] = out


# --------------------- params packing (hoisted, run ONCE) -------------------
def pack_params(params):
    """Pack all params-only kernel operands once (outside the per-call path)."""
    f32 = jnp.float32
    # speaker path: fuse v_linears[1] with relation_s2u (module hard-codes type 1)
    s2u_w = jnp.dot(params["v_w"][1], params["relation_s2u"]).astype(f32)            # (32, 32)
    s2u_b = jnp.dot(params["v_b"][1][None, :], params["relation_s2u"]).astype(f32)   # (1, 32)

    # fused projection: rows [W_type0; W_type1; b_type0; b_type1], cols [K|V|Q|S] -> (66, 128)
    w_rows, b_rows = [], []
    for t in range(NUM_TYPES):
        w_rows.append(jnp.concatenate(
            [params["k_w"][t], params["v_w"][t], params["q_w"][t], s2u_w], axis=1))
        b_rows.append(jnp.concatenate(
            [params["k_b"][t][None], params["v_b"][t][None], params["q_b"][t][None], s2u_b], axis=1))
    w_kvqs = jnp.concatenate(w_rows + b_rows, axis=0).astype(f32)

    # relation transform: lane-dense [rel_0 | rel_1] where rel_r = blockdiag(att_bd_r, msg_bd_r)
    def rel_block(r):
        bd = jnp.zeros((2 * OUT_DIM, 2 * OUT_DIM), f32)
        for h in range(N_HEADS):
            a = slice(h * D_K, (h + 1) * D_K)
            m = slice(OUT_DIM + h * D_K, OUT_DIM + (h + 1) * D_K)
            bd = bd.at[a, a].set(params["relation_att"][r, h])
            bd = bd.at[m, m].set(params["relation_msg"][r, h])
        return bd
    rel_wide = jnp.concatenate([rel_block(r) for r in range(NUM_RELATIONS)], axis=1).astype(f32)

    # misc slab: a_w for both types (lane offset 0) + head one-hots (compile-time constants)
    w_a_both = jnp.concatenate([params["a_w"][t] for t in range(NUM_TYPES)], axis=1).astype(f32)
    d = jnp.arange(OUT_DIM)
    head_oh = (d[:, None] // D_K == jnp.arange(N_HEADS)[None, :]).astype(f32)        # (32, 4)
    lanes = 4 * OUT_DIM
    top = jnp.concatenate(
        [w_a_both, head_oh, jnp.zeros((OUT_DIM, lanes - NUM_TYPES * OUT_DIM - N_HEADS), f32)], axis=1)
    bot = jnp.concatenate([head_oh.T, jnp.zeros((N_HEADS, lanes - OUT_DIM), f32)], axis=1)
    misc = jnp.concatenate([top, bot], axis=0)                                       # (36, 128)

    return {
        "w_kvqs": w_kvqs, "rel_wide": rel_wide, "misc": misc,
        "alpha_t": jax.nn.sigmoid(params["skip"]).astype(f32),                       # (T,)
        "a_b": params["a_b"].astype(f32),                                            # (T, OUT)
        "pri_scaled": (params["relation_pri"] / SQRT_DK).astype(f32),                # (T, R, T, H)
    }


# ------------------------ per-batch block preprocessing ---------------------
def _build_block_inputs(packed, node_inp, node_type, edge_index, edge_type, gpb):
    f32 = jnp.float32
    B, N, _ = node_inp.shape
    E = edge_index.shape[-1]
    nblk = B // gpb
    Nb, Eb = gpb * N, gpb * E

    # block-local node ids (graphs are stacked block-diagonally inside a block)
    goff = (jnp.arange(B, dtype=jnp.int32) % gpb) * N
    src = (edge_index[:, 0, :] + goff[:, None]).reshape(nblk, Eb)
    tgt = (edge_index[:, 1, :] + goff[:, None]).reshape(nblk, Eb)
    et  = edge_type.reshape(nblk, Eb)
    nt  = node_type.reshape(nblk, Nb)
    x   = node_inp.reshape(nblk, Nb, IN_DIM).astype(f32)

    src_oh = jax.nn.one_hot(src, Nb, dtype=f32)                              # (nblk, Eb, Nb)
    tgt_oh = jax.nn.one_hot(tgt, Nb, dtype=f32)
    rel_mask = jax.nn.one_hot(et, NUM_RELATIONS, dtype=f32)                  # (nblk, Eb, R)
    src_rel = [src_oh * rel_mask[..., r:r + 1] for r in range(NUM_RELATIONS)]

    # per-edge relation_pri[target_type, rel, source_type] / sqrt(d_k)
    st = jnp.take_along_axis(nt, src, axis=1)
    tt = jnp.take_along_axis(nt, tgt, axis=1)
    pri = packed["pri_scaled"][tt, et, st]                                   # (nblk, Eb, H)

    # "last write wins" scatter-set reproducing
    #   speaker_information[src[e]] = speaker_message[e]  for edges with edge_type == 0,
    # composed with the target gather: sp_info = sp_map @ (x @ W_s2u + b_s2u)
    e_ids = jnp.arange(Eb, dtype=jnp.int32)
    n_ids = jnp.arange(Nb, dtype=jnp.int32)
    cand = jnp.where((et[:, None, :] == 0) & (src[:, None, :] == n_ids[None, :, None]),
                     e_ids[None, None, :], -1)                               # (nblk, Nb, Eb)
    win = jnp.max(cand, axis=2)
    scatter_set = (e_ids[None, None, :] == win[..., None]).astype(f32)
    sp_map = jnp.einsum("bne,bem->bnm", scatter_set, tgt_oh, precision=_EXACT)  # {0,1} entries

    # node-type-dependent per-node precomputes (bias/skip folded XLA-side)
    nt_oh = jax.nn.one_hot(nt, NUM_TYPES, dtype=f32)                         # (nblk, Nb, T)
    alpha = packed["alpha_t"][nt][..., None]                                 # (nblk, Nb, 1)
    ab_skip = alpha * packed["a_b"][nt] + (1.0 - alpha) * x                  # (nblk, Nb, OUT)
    x_aug = jnp.concatenate(
        [x * nt_oh[..., t:t + 1] for t in range(NUM_TYPES)] + [nt_oh], axis=-1)  # (nblk, Nb, 66)

    node_pack = jnp.concatenate(
        [x_aug, ab_skip, alpha * nt_oh, sp_map, jnp.swapaxes(tgt_oh, 1, 2)],
        axis=-1).reshape(nblk * Nb, -1)
    edge_pack = jnp.concatenate(src_rel + [tgt_oh, pri], axis=-1).reshape(nblk * Eb, -1)
    return node_pack, edge_pack, nblk, Nb, Eb


# ------------------------------- forward ------------------------------------
def graph_conv_hgt(packed, node_inp, node_type, edge_index, edge_type,
                   node_position=None, *, graphs_per_block=4):
    """Batched GraphConv('hgt').forward.

    node_inp: (B, N, IN), node_type: (B, N), edge_index: (B, 2, E), edge_type: (B, E).
    `packed` is the output of pack_params(params) (params-only packing hoisted out of
    the per-call path).  node_position accepted but unused (as in HGTConv).
    """
    del node_position
    B, N, _ = node_inp.shape
    assert B % graphs_per_block == 0, "batch must be divisible by graphs_per_block"
    node_pack, edge_pack, nblk, Nb, Eb = _build_block_inputs(
        packed, node_inp, node_type, edge_index, edge_type, graphs_per_block)
    NL, EL = node_pack.shape[1], edge_pack.shape[1]

    out = pl.pallas_call(
        _hgt_kernel,
        out_shape=jax.ShapeDtypeStruct((nblk * Nb, OUT_DIM), jnp.float32),
        grid=(nblk,),
        in_specs=[
            pl.BlockSpec((Nb, NL), lambda b: (b, 0)),                 # per-block node data (pipelined)
            pl.BlockSpec((Eb, EL), lambda b: (b, 0)),                 # per-block edge data (pipelined)
            pl.BlockSpec(packed["w_kvqs"].shape, lambda b: (0, 0)),   # weights: constant block index
            pl.BlockSpec(packed["rel_wide"].shape, lambda b: (0, 0)), #   -> stay VMEM-resident
            pl.BlockSpec(packed["misc"].shape, lambda b: (0, 0)),
        ],
        out_specs=pl.BlockSpec((Nb, OUT_DIM), lambda b: (b, 0)),
        # "parallel" shards the block axis across cores only on v7x (2 TC/chip);
        # it is a no-op on v5e/v6e (1 TC/chip).
        compiler_params=pltpu.CompilerParams(dimension_semantics=("parallel",)),
    )(node_pack, edge_pack, packed["w_kvqs"], packed["rel_wide"], packed["misc"])
    return out.reshape(B, N, OUT_DIM)


# ------------------------------ init & reference ----------------------------
def init_params(key):
    f32 = jnp.float32
    ks = jax.random.split(key, 11)
    lin_b = 1.0 / math.sqrt(IN_DIM)
    a_b = 1.0 / math.sqrt(OUT_DIM)
    g_att = math.sqrt(6.0 / (D_K + D_K))
    g_s2u = math.sqrt(6.0 / (OUT_DIM + OUT_DIM))
    u = jax.random.uniform
    return {
        "k_w": u(ks[0], (NUM_TYPES, IN_DIM, OUT_DIM), f32, -lin_b, lin_b),
        "k_b": u(ks[1], (NUM_TYPES, OUT_DIM), f32, -lin_b, lin_b),
        "q_w": u(ks[2], (NUM_TYPES, IN_DIM, OUT_DIM), f32, -lin_b, lin_b),
        "q_b": u(ks[3], (NUM_TYPES, OUT_DIM), f32, -lin_b, lin_b),
        "v_w": u(ks[4], (NUM_TYPES, IN_DIM, OUT_DIM), f32, -lin_b, lin_b),
        "v_b": u(ks[5], (NUM_TYPES, OUT_DIM), f32, -lin_b, lin_b),
        "a_w": u(ks[6], (NUM_TYPES, OUT_DIM, OUT_DIM), f32, -a_b, a_b),
        "a_b": u(ks[7], (NUM_TYPES, OUT_DIM), f32, -a_b, a_b),
        "relation_att": u(ks[8], (NUM_RELATIONS, N_HEADS, D_K, D_K), f32, -g_att, g_att),
        "relation_msg": u(ks[9], (NUM_RELATIONS, N_HEADS, D_K, D_K), f32, -g_att, g_att),
        "relation_pri": jnp.ones((NUM_TYPES, NUM_RELATIONS, NUM_TYPES, N_HEADS), f32),
        "relation_s2u": u(ks[10], (OUT_DIM, OUT_DIM), f32, -g_s2u, g_s2u),  # (1,out,out) squeezed
        "skip": jnp.ones((NUM_TYPES,), f32),
    }


def hgt_reference(params, node_inp, node_type, edge_index, edge_type,
                  weight_precision=jax.lax.Precision.HIGHEST):
    """Pure-JAX mirror of HGTConv (eval mode) for a SINGLE graph."""
    wp = weight_precision
    src, tgt = edge_index[0], edge_index[1]
    E, N = src.shape[0], node_inp.shape[0]
    H, dk = N_HEADS, D_K
    x_i, x_j = node_inp[tgt], node_inp[src]

    res_att = jnp.zeros((E, H))
    res_msg = jnp.zeros((E, H, dk))
    for st in range(NUM_TYPES):
        for tt in range(NUM_TYPES):
            for r in range(NUM_RELATIONS):
                mask = (node_type[src] == st) & (node_type[tgt] == tt) & (edge_type == r)
                q = (jnp.dot(x_i, params["q_w"][tt], precision=wp) + params["q_b"][tt]).reshape(E, H, dk)
                k = (jnp.dot(x_j, params["k_w"][st], precision=wp) + params["k_b"][st]).reshape(E, H, dk)
                k = jnp.einsum('ehd,hdf->ehf', k, params["relation_att"][r], precision=wp)
                att = (q * k).sum(-1) * params["relation_pri"][tt, r, st] / SQRT_DK
                v = (jnp.dot(x_j, params["v_w"][st], precision=wp) + params["v_b"][st]).reshape(E, H, dk)
                msg = jnp.einsum('ehd,hdf->ehf', v, params["relation_msg"][r], precision=wp)
                res_att = jnp.where(mask[:, None], att, res_att)
                res_msg = jnp.where(mask[:, None, None], msg, res_msg)

    seg_max = jnp.full((N, H), -jnp.inf).at[tgt].max(res_att)
    expv = jnp.exp(res_att - seg_max[tgt])
    seg_sum = jnp.zeros((N, H)).at[tgt].add(expv)
    att = expv / (seg_sum[tgt] + 1e-16)
    aggr = jnp.zeros((N, OUT_DIM)).at[tgt].add((res_msg * att[..., None]).reshape(E, OUT_DIM))

    sp_in = jnp.dot(x_i, params["v_w"][1], precision=wp) + params["v_b"][1]
    sp_msg = jnp.dot(sp_in, params["relation_s2u"], precision=wp)
    sp_info = jnp.zeros((N, OUT_DIM))
    et_np, src_np = np.asarray(edge_type), np.asarray(src)
    for e in range(E):
        if et_np[e] == 0:
            sp_info = sp_info.at[src_np[e]].set(sp_msg[e])

    h = jax.nn.gelu(aggr + sp_info, approximate=False)
    out = jnp.zeros((N, OUT_DIM))
    for t in range(NUM_TYPES):
        alpha = jax.nn.sigmoid(params["skip"][t])
        lin = jnp.dot(h, params["a_w"][t], precision=wp) + params["a_b"][t]
        out = jnp.where((node_type == t)[:, None], alpha * lin + (1 - alpha) * node_inp, out)
    return out


if __name__ == "__main__":
    key = jax.random.PRNGKey(0)
    k_param, k_x, k_src, k_tgt, k_et = jax.random.split(key, 5)
    params = init_params(k_param)
    packed = pack_params(params)          # params-only packing: done ONCE, outside the forward

    B = 8                                 # graphs per call (small demo; grid of 2 blocks of 4 graphs)
    node_inp = jax.random.normal(k_x, (B, N_NODES, IN_DIM), jnp.float32)
    node_type = jnp.tile(jnp.array([0, 0, 0, 0, 0, 0, 1, 1], jnp.int32)[None], (B, 1))
    src = jax.random.randint(k_src, (B, N_EDGES), 0, N_NODES, dtype=jnp.int32)
    tgt = jax.random.randint(k_tgt, (B, N_EDGES), 0, N_NODES, dtype=jnp.int32)
    edge_index = jnp.stack([src, tgt], axis=1)                               # (B, 2, E) coo
    edge_type = jax.random.randint(k_et, (B, N_EDGES), 0, NUM_RELATIONS, dtype=jnp.int32)
    node_position = jnp.tile(jnp.arange(N_NODES, dtype=jnp.int32)[None], (B, 1))  # unused by HGTConv

    fwd = jax.jit(functools.partial(graph_conv_hgt, graphs_per_block=4))
    out = jax.block_until_ready(fwd(packed, node_inp, node_type, edge_index, edge_type, node_position))

    assert out.shape == (B, N_NODES, OUT_DIM)
    assert bool(jnp.all(jnp.isfinite(out)))

    for b in range(B):
        # (1) semantic check vs a reference that uses the SAME single-pass-bf16 weight-matmul
        #     precision; residuals are the extra bf16 one-hot gathers, accumulation order,
        #     the exact speaker-weight refactor and the erf polynomial.
        ref_mxu = hgt_reference(params, node_inp[b], node_type[b], edge_index[b], edge_type[b],
                                weight_precision=jax.lax.Precision.DEFAULT)
        np.testing.assert_allclose(np.asarray(out[b]), np.asarray(ref_mxu), rtol=2e-2, atol=2e-2)
        # (2) drift check vs full-float32 reference; tolerance sized for single-pass bf16
        #     (~2^-8 relative) across the weight matmuls plus bf16 one-hot gathers.
        ref_f32 = hgt_reference(params, node_inp[b], node_type[b], edge_index[b], edge_type[b],
                                weight_precision=jax.lax.Precision.HIGHEST)
        np.testing.assert_allclose(np.asarray(out[b]), np.asarray(ref_f32), rtol=5e-2, atol=5e-2)

    print("KERNEL_OK")
</pallas_src>

<mosaic_0001>
module attributes {stable_mosaic.version = 11 : i64} {
  func.func @_hgt_kernel(%arg0: i32, %arg1: memref<32x196xf32, #tpu.memory_space<vmem>>, %arg2: memref<64x100xf32, #tpu.memory_space<vmem>>, %arg3: memref<66x128xf32, #tpu.memory_space<vmem>>, %arg4: memref<64x128xf32, #tpu.memory_space<vmem>>, %arg5: memref<36x128xf32, #tpu.memory_space<vmem>>, %arg6: memref<32x32xf32, #tpu.memory_space<vmem>>) attributes {dimension_semantics = [#tpu.dimension_semantics<parallel>], iteration_bounds = array<i64: 2>, scalar_prefetch = 0 : i64, scratch_operands = 0 : i64, tpu.core_type = #tpu.core_type<tc>, window_params = [{transform_indices = @transform_0, window_bounds = array<i64: 32, 196>}, {transform_indices = @transform_1, window_bounds = array<i64: 64, 100>}, {pipeline_mode = #tpu.pipeline_mode<synchronous>, transform_indices = @transform_2, window_bounds = array<i64: 66, 128>}, {pipeline_mode = #tpu.pipeline_mode<synchronous>, transform_indices = @transform_3, window_bounds = array<i64: 64, 128>}, {pipeline_mode = #tpu.pipeline_mode<synchronous>, transform_indices = @transform_4, window_bounds = array<i64: 36, 128>}, {transform_indices = @transform_5, window_bounds = array<i64: 32, 32>}]} {
    %c0 = arith.constant 0 : index
    %c0_0 = arith.constant 0 : index
    %0 = vector.load %arg1[%c0, %c0_0] : memref<32x196xf32, #tpu.memory_space<vmem>>, vector<32x66xf32>
    %c0_1 = arith.constant 0 : index
    %c66 = arith.constant 66 : index
    %1 = vector.load %arg1[%c0_1, %c66] : memref<32x196xf32, #tpu.memory_space<vmem>>, vector<32x32xf32>
    %c0_2 = arith.constant 0 : index
    %c98 = arith.constant 98 : index
    %2 = vector.load %arg1[%c0_2, %c98] : memref<32x196xf32, #tpu.memory_space<vmem>>, vector<32x2xf32>
    %c0_3 = arith.constant 0 : index
    %c100 = arith.constant 100 : index
    %3 = vector.load %arg1[%c0_3, %c100] : memref<32x196xf32, #tpu.memory_space<vmem>>, vector<32x32xf32>
    %c0_4 = arith.constant 0 : index
    %c132 = arith.constant 132 : index
    %4 = vector.load %arg1[%c0_4, %c132] : memref<32x196xf32, #tpu.memory_space<vmem>>, vector<32x64xf32>
    %c0_5 = arith.constant 0 : index
    %c64 = arith.constant 64 : index
    %5 = vector.load %arg2[%c0_5, %c64] : memref<64x100xf32, #tpu.memory_space<vmem>>, vector<64x32xf32>
    %c0_6 = arith.constant 0 : index
    %c96 = arith.constant 96 : index
    %6 = vector.load %arg2[%c0_6, %c96] : memref<64x100xf32, #tpu.memory_space<vmem>>, vector<64x4xf32>
    %c0_7 = arith.constant 0 : index
    %c0_8 = arith.constant 0 : index
    %7 = vector.load %arg5[%c0_7, %c0_8] : memref<36x128xf32, #tpu.memory_space<vmem>>, vector<32x64xf32>
    %c0_9 = arith.constant 0 : index
    %c64_10 = arith.constant 64 : index
    %8 = vector.load %arg5[%c0_9, %c64_10] : memref<36x128xf32, #tpu.memory_space<vmem>>, vector<32x4xf32>
    %c32 = arith.constant 32 : index
    %c0_11 = arith.constant 0 : index
    %9 = vector.load %arg5[%c32, %c0_11] : memref<36x128xf32, #tpu.memory_space<vmem>>, vector<4x32xf32>
    %c0_12 = arith.constant 0 : index
    %c0_13 = arith.constant 0 : index
    %10 = vector.load %arg3[%c0_12, %c0_13] : memref<66x128xf32, #tpu.memory_space<vmem>>, vector<66x128xf32>
    %cst = arith.constant dense<0.000000e+00> : vector<32x128xf32>
    %11 = tpu.matmul %0, %10, %cst {dimension_numbers = #tpu.dot_dimension_numbers<[1], [0], [0], [1], [0, 0, 1, 1], [], []>} : vector<32x66xf32>, vector<66x128xf32>, vector<32x128xf32> -> vector<32x128xf32>
    %12 = vector.extract_strided_slice %11 {offsets = [0, 0], sizes = [32, 64], strides = [1, 1]} : vector<32x128xf32> to vector<32x64xf32>
    %13 = vector.extract_strided_slice %11 {offsets = [0, 64], sizes = [32, 32], strides = [1, 1]} : vector<32x128xf32> to vector<32x32xf32>
    %14 = vector.extract_strided_slice %11 {offsets = [0, 96], sizes = [32, 32], strides = [1, 1]} : vector<32x128xf32> to vector<32x32xf32>
    %c0_14 = arith.constant 0 : index
    %c0_15 = arith.constant 0 : index
    %15 = vector.load %arg4[%c0_14, %c0_15] : memref<64x128xf32, #tpu.memory_space<vmem>>, vector<64x128xf32>
    %cst_16 = arith.constant dense<0.000000e+00> : vector<32x128xf32>
    %16 = tpu.matmul %12, %15, %cst_16 {dimension_numbers = #tpu.dot_dimension_numbers<[1], [0], [0], [1], [0, 0, 1, 1], [], []>} : vector<32x64xf32>, vector<64x128xf32>, vector<32x128xf32> -> vector<32x128xf32>
    %c0_17 = arith.constant 0 : index
    %c0_18 = arith.constant 0 : index
    %17 = vector.load %arg2[%c0_17, %c0_18] : memref<64x100xf32, #tpu.memory_space<vmem>>, vector<64x32xf32>
    %18 = vector.extract_strided_slice %16 {offsets = [0, 0], sizes = [32, 64], strides = [1, 1]} : vector<32x128xf32> to vector<32x64xf32>
    %cst_19 = arith.constant dense<0.000000e+00> : vector<64x64xf32>
    %19 = tpu.matmul %17, %18, %cst_19 {dimension_numbers = #tpu.dot_dimension_numbers<[1], [0], [0], [1], [0, 0, 1, 1], [], []>} : vector<64x32xf32>, vector<32x64xf32>, vector<64x64xf32> -> vector<64x64xf32>
    %c0_20 = arith.constant 0 : index
    %c32_21 = arith.constant 32 : index
    %20 = vector.load %arg2[%c0_20, %c32_21] : memref<64x100xf32, #tpu.memory_space<vmem>>, vector<64x32xf32>
    %21 = vector.extract_strided_slice %16 {offsets = [0, 64], sizes = [32, 64], strides = [1, 1]} : vector<32x128xf32> to vector<32x64xf32>
    %cst_22 = arith.constant dense<0.000000e+00> : vector<64x64xf32>
    %22 = tpu.matmul %20, %21, %cst_22 {dimension_numbers = #tpu.dot_dimension_numbers<[1], [0], [0], [1], [0, 0, 1, 1], [], []>} : vector<64x32xf32>, vector<32x64xf32>, vector<64x64xf32> -> vector<64x64xf32>
    %23 = arith.addf %19, %22 : vector<64x64xf32>
    %24 = vector.extract_strided_slice %23 {offsets = [0, 0], sizes = [64, 32], strides = [1, 1]} : vector<64x64xf32> to vector<64x32xf32>
    %25 = vector.extract_strided_slice %23 {offsets = [0, 32], sizes = [64, 32], strides = [1, 1]} : vector<64x64xf32> to vector<64x32xf32>
    %cst_23 = arith.constant dense<0.000000e+00> : vector<64x32xf32>
    %26 = tpu.matmul %5, %13, %cst_23 {dimension_numbers = #tpu.dot_dimension_numbers<[1], [0], [0], [1], [0, 0, 1, 1], [], []>} : vector<64x32xf32>, vector<32x32xf32>, vector<64x32xf32> -> vector<64x32xf32>
    %27 = arith.mulf %26, %24 : vector<64x32xf32>
    %cst_24 = arith.constant dense<0.000000e+00> : vector<64x4xf32>
    %28 = tpu.matmul %27, %8, %cst_24 {dimension_numbers = #tpu.dot_dimension_numbers<[1], [0], [0], [1], [0, 0, 1, 1], [], []>} : vector<64x32xf32>, vector<32x4xf32>, vector<64x4xf32> -> vector<64x4xf32>
    %29 = arith.mulf %28, %6 : vector<64x4xf32>
    %30 = vector.extract_strided_slice %29 {offsets = [0, 0], sizes = [64, 1], strides = [1, 1]} : vector<64x4xf32> to vector<64x1xf32>
    %cst_25 = arith.constant 5.000000e-01 : f32
    %31 = vector.broadcast %cst_25 : f32 to vector<64x32xf32>
    %32 = arith.cmpf ogt, %5, %31 : vector<64x32xf32>
    %cst_26 = arith.constant -1.000000e+30 : f32
    %33 = vector.shape_cast %30 : vector<64x1xf32> to vector<64x1xf32>
    %34 = vector.broadcast %33 : vector<64x1xf32> to vector<64x32xf32>
    %35 = vector.broadcast %cst_26 : f32 to vector<64x32xf32>
    %36 = arith.select %32, %34, %35 : vector<64x32xi1>, vector<64x32xf32>
    %cst_27 = arith.constant dense<0xFF800000> : vector<32xf32>
    %37 = vector.multi_reduction <maximumf>, %36, %cst_27 [0] : vector<64x32xf32> to vector<32xf32>
    %38 = vector.shape_cast %37 : vector<32xf32> to vector<1x32xf32>
    %39 = vector.broadcast %38 : vector<1x32xf32> to vector<64x32xf32>
    %40 = arith.mulf %5, %39 : vector<64x32xf32>
    %cst_28 = arith.constant dense<0.000000e+00> : vector<64xf32>
    %41 = vector.multi_reduction <add>, %40, %cst_28 [1] : vector<64x32xf32> to vector<64xf32>
    %42 = vector.shape_cast %41 : vector<64xf32> to vector<64x1xf32>
    %43 = arith.subf %30, %42 : vector<64x1xf32>
    %44 = vector.extract_strided_slice %29 {offsets = [0, 1], sizes = [64, 1], strides = [1, 1]} : vector<64x4xf32> to vector<64x1xf32>
    %cst_29 = arith.constant 5.000000e-01 : f32
    %45 = vector.broadcast %cst_29 : f32 to vector<64x32xf32>
    %46 = arith.cmpf ogt, %5, %45 : vector<64x32xf32>
    %cst_30 = arith.constant -1.000000e+30 : f32
    %47 = vector.shape_cast %44 : vector<64x1xf32> to vector<64x1xf32>
    %48 = vector.broadcast %47 : vector<64x1xf32> to vector<64x32xf32>
    %49 = vector.broadcast %cst_30 : f32 to vector<64x32xf32>
    %50 = arith.select %46, %48, %49 : vector<64x32xi1>, vector<64x32xf32>
    %cst_31 = arith.constant dense<0xFF800000> : vector<32xf32>
    %51 = vector.multi_reduction <maximumf>, %50, %cst_31 [0] : vector<64x32xf32> to vector<32xf32>
    %52 = vector.shape_cast %51 : vector<32xf32> to vector<1x32xf32>
    %53 = vector.broadcast %52 : vector<1x32xf32> to vector<64x32xf32>
    %54 = arith.mulf %5, %53 : vector<64x32xf32>
    %cst_32 = arith.constant dense<0.000000e+00> : vector<64xf32>
    %55 = vector.multi_reduction <add>, %54, %cst_32 [1] : vector<64x32xf32> to vector<64xf32>
    %56 = vector.shape_cast %55 : vector<64xf32> to vector<64x1xf32>
    %57 = arith.subf %44, %56 : vector<64x1xf32>
    %58 = vector.extract_strided_slice %29 {offsets = [0, 2], sizes = [64, 1], strides = [1, 1]} : vector<64x4xf32> to vector<64x1xf32>
    %cst_33 = arith.constant 5.000000e-01 : f32
    %59 = vector.broadcast %cst_33 : f32 to vector<64x32xf32>
    %60 = arith.cmpf ogt, %5, %59 : vector<64x32xf32>
    %cst_34 = arith.constant -1.000000e+30 : f32
    %61 = vector.shape_cast %58 : vector<64x1xf32> to vector<64x1xf32>
    %62 = vector.broadcast %61 : vector<64x1xf32> to vector<64x32xf32>
    %63 = vector.broadcast %cst_34 : f32 to vector<64x32xf32>
    %64 = arith.select %60, %62, %63 : vector<64x32xi1>, vector<64x32xf32>
    %cst_35 = arith.constant dense<0xFF800000> : vector<32xf32>
    %65 = vector.multi_reduction <maximumf>, %64, %cst_35 [0] : vector<64x32xf32> to vector<32xf32>
    %66 = vector.shape_cast %65 : vector<32xf32> to vector<1x32xf32>
    %67 = vector.broadcast %66 : vector<1x32xf32> to vector<64x32xf32>
    %68 = arith.mulf %5, %67 : vector<64x32xf32>
    %cst_36 = arith.constant dense<0.000000e+00> : vector<64xf32>
    %69 = vector.multi_reduction <add>, %68, %cst_36 [1] : vector<64x32xf32> to vector<64xf32>
    %70 = vector.shape_cast %69 : vector<64xf32> to vector<64x1xf32>
    %71 = arith.subf %58, %70 : vector<64x1xf32>
    %72 = vector.extract_strided_slice %29 {offsets = [0, 3], sizes = [64, 1], strides = [1, 1]} : vector<64x4xf32> to vector<64x1xf32>
    %cst_37 = arith.constant 5.000000e-01 : f32
    %73 = vector.broadcast %cst_37 : f32 to vector<64x32xf32>
    %74 = arith.cmpf ogt, %5, %73 : vector<64x32xf32>
    %cst_38 = arith.constant -1.000000e+30 : f32
    %75 = vector.shape_cast %72 : vector<64x1xf32> to vector<64x1xf32>
    %76 = vector.broadcast %75 : vector<64x1xf32> to vector<64x32xf32>
    %77 = vector.broadcast %cst_38 : f32 to vector<64x32xf32>
    %78 = arith.select %74, %76, %77 : vector<64x32xi1>, vector<64x32xf32>
    %cst_39 = arith.constant dense<0xFF800000> : vector<32xf32>
    %79 = vector.multi_reduction <maximumf>, %78, %cst_39 [0] : vector<64x32xf32> to vector<32xf32>
    %80 = vector.shape_cast %79 : vector<32xf32> to vector<1x32xf32>
    %81 = vector.broadcast %80 : vector<1x32xf32> to vector<64x32xf32>
    %82 = arith.mulf %5, %81 : vector<64x32xf32>
    %cst_40 = arith.constant dense<0.000000e+00> : vector<64xf32>
    %83 = vector.multi_reduction <add>, %82, %cst_40 [1] : vector<64x32xf32> to vector<64xf32>
    %84 = vector.shape_cast %83 : vector<64xf32> to vector<64x1xf32>
    %85 = arith.subf %72, %84 : vector<64x1xf32>
    %86 = tpu.concatenate %43, %57, %71, %85 in 1 : vector<64x1xf32>, vector<64x1xf32>, vector<64x1xf32>, vector<64x1xf32> -> vector<64x4xf32>
    %87 = math.exp %86 : vector<64x4xf32>
    %cst_41 = arith.constant dense<0.000000e+00> : vector<32x4xf32>
    %88 = tpu.matmul %4, %87, %cst_41 {dimension_numbers = #tpu.dot_dimension_numbers<[1], [0], [0], [1], [0, 0, 1, 1], [], []>} : vector<32x64xf32>, vector<64x4xf32>, vector<32x4xf32> -> vector<32x4xf32>
    %cst_42 = arith.constant dense<0.000000e+00> : vector<64x4xf32>
    %89 = tpu.matmul %5, %88, %cst_42 {dimension_numbers = #tpu.dot_dimension_numbers<[1], [0], [0], [1], [0, 0, 1, 1], [], []>} : vector<64x32xf32>, vector<32x4xf32>, vector<64x4xf32> -> vector<64x4xf32>
    %cst_43 = arith.constant 1.000000e-16 : f32
    %90 = vector.broadcast %cst_43 : f32 to vector<64x4xf32>
    %91 = arith.addf %89, %90 : vector<64x4xf32>
    %92 = tpu.reciprocal %91 {approx = true} : vector<64x4xf32> -> vector<64x4xf32>
    %93 = arith.mulf %87, %92 : vector<64x4xf32>
    %cst_44 = arith.constant dense<0.000000e+00> : vector<64x32xf32>
    %94 = tpu.matmul %93, %9, %cst_44 {dimension_numbers = #tpu.dot_dimension_numbers<[1], [0], [0], [1], [0, 0, 1, 1], [], []>} : vector<64x4xf32>, vector<4x32xf32>, vector<64x32xf32> -> vector<64x32xf32>
    %95 = arith.mulf %25, %94 : vector<64x32xf32>
    %cst_45 = arith.constant dense<0.000000e+00> : vector<32x32xf32>
    %96 = tpu.matmul %4, %95, %cst_45 {dimension_numbers = #tpu.dot_dimension_numbers<[1], [0], [0], [1], [0, 0, 1, 1], [], []>} : vector<32x64xf32>, vector<64x32xf32>, vector<32x32xf32> -> vector<32x32xf32>
    %cst_46 = arith.constant dense<0.000000e+00> : vector<32x32xf32>
    %97 = tpu.matmul %3, %14, %cst_46 {dimension_numbers = #tpu.dot_dimension_numbers<[1], [0], [0], [1], [0, 0, 1, 1], [], []>} : vector<32x32xf32>, vector<32x32xf32>, vector<32x32xf32> -> vector<32x32xf32>
    %98 = arith.addf %96, %97 : vector<32x32xf32>
    %cst_47 = arith.constant 5.000000e-01 : f32
    %99 = vector.broadcast %cst_47 : f32 to vector<32x32xf32>
    %100 = arith.mulf %99, %98 : vector<32x32xf32>
    %cst_48 = arith.constant 0.707106769 : f32
    %101 = vector.broadcast %cst_48 : f32 to vector<32x32xf32>
    %102 = arith.mulf %98, %101 : vector<32x32xf32>
    %cst_49 = arith.constant 0.000000e+00 : f32
    %103 = vector.broadcast %cst_49 : f32 to vector<32x32xf32>
    %104 = arith.cmpf oge, %102, %103 : vector<32x32xf32>
    %cst_50 = arith.constant 1.000000e+00 : f32
    %cst_51 = arith.constant -1.000000e+00 : f32
    %105 = vector.broadcast %cst_50 : f32 to vector<32x32xf32>
    %106 = vector.broadcast %cst_51 : f32 to vector<32x32xf32>
    %107 = arith.select %104, %105, %106 : vector<32x32xi1>, vector<32x32xf32>
    %108 = math.absf %102 : vector<32x32xf32>
    %cst_52 = arith.constant 0.327591091 : f32
    %109 = vector.broadcast %cst_52 : f32 to vector<32x32xf32>
    %110 = arith.mulf %109, %108 : vector<32x32xf32>
    %cst_53 = arith.constant 1.000000e+00 : f32
    %111 = vector.broadcast %cst_53 : f32 to vector<32x32xf32>
    %112 = arith.addf %111, %110 : vector<32x32xf32>
    %cst_54 = arith.constant 1.000000e+00 : f32
    %113 = vector.broadcast %cst_54 : f32 to vector<32x32xf32>
    %114 = arith.divf %113, %112 : vector<32x32xf32>
    %cst_55 = arith.constant 1.06140542 : f32
    %115 = vector.broadcast %cst_55 : f32 to vector<32x32xf32>
    %116 = arith.mulf %115, %114 : vector<32x32xf32>
    %cst_56 = arith.constant -1.45315206 : f32
    %117 = vector.broadcast %cst_56 : f32 to vector<32x32xf32>
    %118 = arith.addf %116, %117 : vector<32x32xf32>
    %119 = arith.mulf %118, %114 : vector<32x32xf32>
    %cst_57 = arith.constant 1.42141378 : f32
    %120 = vector.broadcast %cst_57 : f32 to vector<32x32xf32>
    %121 = arith.addf %119, %120 : vector<32x32xf32>
    %122 = arith.mulf %121, %114 : vector<32x32xf32>
    %cst_58 = arith.constant -0.284496725 : f32
    %123 = vector.broadcast %cst_58 : f32 to vector<32x32xf32>
    %124 = arith.addf %122, %123 : vector<32x32xf32>
    %125 = arith.mulf %124, %114 : vector<32x32xf32>
    %cst_59 = arith.constant 0.254829586 : f32
    %126 = vector.broadcast %cst_59 : f32 to vector<32x32xf32>
    %127 = arith.addf %125, %126 : vector<32x32xf32>
    %128 = arith.mulf %127, %114 : vector<32x32xf32>
    %cst_60 = arith.constant 0.000000e+00 : f32
    %129 = vector.broadcast %cst_60 : f32 to vector<32x32xf32>
    %130 = arith.subf %129, %108 : vector<32x32xf32>
    %131 = arith.mulf %130, %108 : vector<32x32xf32>
    %132 = math.exp %131 : vector<32x32xf32>
    %133 = arith.mulf %128, %132 : vector<32x32xf32>
    %cst_61 = arith.constant 1.000000e+00 : f32
    %134 = vector.broadcast %cst_61 : f32 to vector<32x32xf32>
    %135 = arith.subf %134, %133 : vector<32x32xf32>
    %136 = arith.mulf %107, %135 : vector<32x32xf32>
    %cst_62 = arith.constant 1.000000e+00 : f32
    %137 = vector.broadcast %cst_62 : f32 to vector<32x32xf32>
    %138 = arith.addf %137, %136 : vector<32x32xf32>
    %139 = arith.mulf %100, %138 : vector<32x32xf32>
    %cst_63 = arith.constant dense<0.000000e+00> : vector<32x64xf32>
    %140 = tpu.matmul %139, %7, %cst_63 {dimension_numbers = #tpu.dot_dimension_numbers<[1], [0], [0], [1], [0, 0, 1, 1], [], []>} : vector<32x32xf32>, vector<32x64xf32>, vector<32x64xf32> -> vector<32x64xf32>
    %141 = vector.extract_strided_slice %2 {offsets = [0, 0], sizes = [32, 1], strides = [1, 1]} : vector<32x2xf32> to vector<32x1xf32>
    %142 = vector.extract_strided_slice %140 {offsets = [0, 0], sizes = [32, 32], strides = [1, 1]} : vector<32x64xf32> to vector<32x32xf32>
    %143 = vector.broadcast %141 : vector<32x1xf32> to vector<32x32xf32>
    %144 = arith.mulf %143, %142 : vector<32x32xf32>
    %145 = arith.addf %1, %144 : vector<32x32xf32>
    %146 = vector.extract_strided_slice %2 {offsets = [0, 1], sizes = [32, 1], strides = [1, 1]} : vector<32x2xf32> to vector<32x1xf32>
    %147 = vector.extract_strided_slice %140 {offsets = [0, 32], sizes = [32, 32], strides = [1, 1]} : vector<32x64xf32> to vector<32x32xf32>
    %148 = vector.broadcast %146 : vector<32x1xf32> to vector<32x32xf32>
    %149 = arith.mulf %148, %147 : vector<32x32xf32>
    %150 = arith.addf %145, %149 : vector<32x32xf32>
    %c0_64 = arith.constant 0 : index
    %c0_65 = arith.constant 0 : index
    %151 = vector.load %arg6[%c0_64, %c0_65] : memref<32x32xf32, #tpu.memory_space<vmem>>, vector<32x32xf32>
    tpu.vector_store %arg6[%c0_64, %c0_65], %150 {strides = array<i32>} : memref<32x32xf32, #tpu.memory_space<vmem>>, vector<32x32xf32>,
    return
  }
  func.func @transform_0(%arg0: i32) -> (i32, i32) {
    %c0_i32 = arith.constant 0 : i32
    %c0_i32_0 = arith.constant 0 : i32
    return %arg0, %c0_i32 : i32, i32
  }
  func.func @transform_1(%arg0: i32) -> (i32, i32) {
    %c0_i32 = arith.constant 0 : i32
    %c0_i32_0 = arith.constant 0 : i32
    return %arg0, %c0_i32 : i32, i32
  }
  func.func @transform_2(%arg0: i32) -> (i32, i32) {
    %c0_i32 = arith.constant 0 : i32
    %c0_i32_0 = arith.constant 0 : i32
    %c0_i32_1 = arith.constant 0 : i32
    return %c0_i32, %c0_i32_0 : i32, i32
  }
  func.func @transform_3(%arg0: i32) -> (i32, i32) {
    %c0_i32 = arith.constant 0 : i32
    %c0_i32_0 = arith.constant 0 : i32
    %c0_i32_1 = arith.constant 0 : i32
    return %c0_i32, %c0_i32_0 : i32, i32
  }
  func.func @transform_4(%arg0: i32) -> (i32, i32) {
    %c0_i32 = arith.constant 0 : i32
    %c0_i32_0 = arith.constant 0 : i32
    %c0_i32_1 = arith.constant 0 : i32
    return %c0_i32, %c0_i32_0 : i32, i32
  }
  func.func @transform_5(%arg0: i32) -> (i32, i32) {
    %c0_i32 = arith.constant 0 : i32
    %c0_i32_0 = arith.constant 0 : i32
    return %arg0, %c0_i32 : i32, i32
  }
}

</mosaic_0001>

<bundles_post_ra>
// kernel: eq.1
= control target key start
LH: loop header
LB: loop body
LE: loop exit
PB: predicated region body
PF: predicated region fallthrough
CT: control target
= control target key end

     0   :  { %s7_s6 = smov 3  ;;  %s14_s9 = smov 3  ;;  %vm4_vm0 = vcmask 64512   ;;  %vm11_vm1 = vcmask 261312   ;;  %vm18_vm2 = vcmask 195712   ;;  %vm25_vm3 = vcmask 130112   ;;  %s69_s0 = inlined_call_operand.vmem [shape: s32[8,8], index: 0, kind: input, shape index: {}]   ;;  %s70_s1 = inlined_call_operand.vmem [shape: s32[2,32], index: 1, kind: output, shape index: {}]  }
   0x1   :  { %v35_v0 = vld [vmem:[%s69_s0 + $0x3] ss:$4 sm:%s7_s6]   ;;  %s41_s10 = smov 24   ;;  %s21_s11 = smov 3  ;;  %v36_v1 = vld [vmem:[%s69_s0 + $0x2] ss:$4 sm:%s14_s9]  }
   0x2   :  { %9 = vrot.lane.b32.xlu0 %v35_v0, %s41_s10  ;;  %v37_v2 = vld [vmem:[%s69_s0 + $0x1] ss:$4 sm:%s21_s11]   ;;  %s2_s16 = smov 3  ;;  %s42_s17 = smov 8  }
   0x3   :  { %23 = vrot.lane.b32.xlu1 %v37_v2, %s42_s17  ;;  %v3_v3 = vld [vmem:[%s69_s0] ss:$4 sm:%s2_s16]   ;;  %s43_s0 = smov 16  }
   0x4   :  { %5 = vst.msk [vmem:[#allocation0] sm:$0x3] %vm4_vm0, %v3_v3  }
   0x6   :  { %16 = vrot.lane.b32.xlu0 %v36_v1, %s43_s0 }
  0x74   :  { %v10_v4 = vpop.permute.xlu0 %9  }
  0x75   :  { %12 = vst.msk [vmem:[#allocation0] sm:$0x3] %vm11_vm1, %v10_v4   ;;  %v24_v5 = vpop.permute.xlu1 %23  }
  0x78   :  { %v17_v6 = vpop.permute.xlu0 %16  }
  0x79   :  { %19 = vst.msk [vmem:[#allocation0] sm:$0x3] %vm18_vm2, %v17_v6  }
  0x7a   :  { %26 = vst.msk [vmem:[#allocation0] sm:$0x3] %vm25_vm3, %v24_v5  }
  0x81   :  { %v31_v7 = vld [vmem:[#allocation0] sm:$0x3] }
  0x82   :  { %34 = vst [vmem:[%s70_s1] sm:$0x3] %v31_v7 }

// kernel: graph_conv_hgt.1
= control target key start
LH: loop header
LB: loop body
LE: loop exit
PB: predicated region body
PF: predicated region fallthrough
CT: control target
= control target key end

     0   :  { %10 = vsyncpa [#allocation3], 0  ;;  %s4429_s0 = inlined_call_operand.vmem [shape: f32[64,196], index: 0, kind: input, shape index: {}]   ;;  %s4430_s1 = inlined_call_operand.vmem [shape: f32[128,100], index: 1, kind: input, shape index: {}]   ;;  %s4431_s2 = inlined_call_operand.vmem [shape: f32[66,128], index: 2, kind: input, shape index: {}]   ;;  %s4432_s3 = inlined_call_operand.vmem [shape: f32[64,128], index: 3, kind: input, shape index: {}]   ;;  %s4433_s4 = inlined_call_operand.vmem [shape: f32[36,128], index: 4, kind: input, shape index: {}]   ;;  %s4434_s5 = inlined_call_operand.hbm [shape: f32[64,32], index: 5, kind: output, shape index: {}]  }
   0x1   :  { %12 = vsyncpa [#allocation3 + $0x1], 0  ;;  %s3449_s18 = smov 0   ;;  %s3451_s19 = smov 0  }
   0x2   :  { %s3453_s20 = smov 0   ;;  %s3455_s21 = smov 0  }
   0x3 LB: > { %s3470_s22 = sadd.s32 4294967295, %s3399_s21   ;;  %s2734_s23 = sadd.s32 4294967294, %s3399_s21   ;;  %s3399_s21 = sphi %s3455_s21, %s4470_s21   ;;  %s3395_s20 = sphi %s3453_s20, %s4469_s20   ;;  %s3391_s19 = sphi %s3451_s19, %s4468_s19   ;;  %s3387_s18 = sphi %s3449_s18, %s4467_s18  }
   0x4   : > { %s3474_s24 = sadd.s32 1, %s3399_s21   ;;  %s140_s25 = sadd.s32 1, %s3395_s20 }
   0x5   : > { %s137_s26 = ssub.s32 %s3399_s21, %s3474_s24  ;;  %p150_p0 = scmp.ne.s32.totalorder %s3395_s20, %s3391_s19 }
   0x6   : > { %p138_p1 = scmp.eq.s32.totalorder %s137_s26, 0  ;;  %p151_p2 = scmp.eq.s32.totalorder %s3470_s22, 1 }
   0x7   : > { %p156_p3 = scmp.ne.s32.totalorder %s3391_s19, %s3387_s18  ;;  %p157_p4 = scmp.eq.s32.totalorder %s2734_s23, 1 }
   0x8   : > { %s3485_s27 = scalar_select %p138_p1, %s3395_s20, %s140_s25  }
   0x9   : > { %p3487_p5 = por %p151_p2, %p150_p0  ;;  %p3491_p6 = por %p157_p4, %p156_p3 }
   0xa   : > { %p2737_p7 = scmp.ge.s32.totalorder %s3399_s21, 1  ;;  %p203_p8 = scmp.lt.s32.totalorder %s3399_s21, 3 }
   0xc   : > { %p204_p9 = pnand %p2737_p7, %p203_p8 }
   0xe   : > { %207 = sbr.rel (%p204_p9) target bundleno = 3131 (0xc3b), region = 40 }
  0x13   : > { %v280_v0 = vld [vmem:[%s4431_s2 + $0x40] sm:$0x3]  ;;  %vm294_vm0 = vcmask 1041408   ;;  %v279_v1 = vld [vmem:[%s4431_s2 + $0x38] sm:$0xff]  ;;  %s2739_s9 = sshll.u32 %s3470_s22, 2  ;;  %v278_v2 = vld [vmem:[%s4431_s2 + $0x30] sm:$0xff] }
  0x14   : > { %2959 = vmatprep.subr.msk.mxu0 %vm294_vm0, %v280_v0  ;;  %p238_p10 = scmp.lt.s32.totalorder %s2739_s9, 7  ;;  %v390_v3 = vld [vmem:[%s4432_s3 + $0x38] sm:$0xff]  ;;  %v389_v4 = vld [vmem:[%s4432_s3 + $0x30] sm:$0xff]  ;;  %v277_v5 = vld [vmem:[%s4431_s2 + $0x28] sm:$0xff]  ;;  %vm281_vm1 = vcmask 539648   ;;  %s2742_s13 = sshll.u32 %s3470_s22, 3 }
  0x15   : > { %2960 = vmatpush3.msk.msra.mxu0 %vm294_vm0, %v280_v0  ;;  %2983 = vmatprep.subr.mxu1 %v390_v3  ;;  %v276_v6 = vld [vmem:[%s4431_s2 + $0x20] sm:$0xff]  ;;  %v388_v7 = vld [vmem:[%s4432_s3 + $0x28] sm:$0xff]  ;;  %v275_v9 = vld [vmem:[%s4431_s2 + $0x18] sm:$0xff]  ;;  %p245_p11 = scmp.lt.s32.totalorder %s2742_s13, 15  ;;  %vm391_vm2 = vcmask 523264   ;;  %vm529_vm3 = vcmask 261120  }
  0x16   : > { %2961 = vmatprep.subr.mxu0 %v279_v1  ;;  %s4472_s9 = smov (!%p238_p10, %s2739_s9), 7  ;;  %2984 = vmatpush3.msra.mxu1 %v390_v3  ;;  %v387_v10 = vld [vmem:[%s4432_s3 + $0x20] sm:$0xff]  ;;  %v274_v11 = vld [vmem:[%s4431_s2 + $0x10] sm:$0xff]  ;;  %v386_v12 = vld [vmem:[%s4432_s3 + $0x18] sm:$0xff]  ;;  %s3402_s25 = smov 64   ;;  %vm1162_vm5 = vcmask 785920  }
  0x17   : > { %2962 = vmatpush3.msra.mxu0 %v279_v1  ;;  %s2823_s23 = sshll.u32 %s4472_s9, 4  ;;  %2985 = vmatprep.subr.mxu1 %v389_v4  ;;  %v273_v13 = vld [vmem:[%s4431_s2 + $0x8] sm:$0xff]  ;;  %v385_v14 = vld [vmem:[%s4432_s3 + $0x10] sm:$0xff]  ;;  %v272_v15 = vld [vmem:[%s4431_s2] sm:$0xff]  ;;  %s4474_s13 = smov (!%p245_p11, %s2742_s13), 15  ;;  %vm1655_vm13 = vcmask 7168  }
  0x18   : > { %2963 = vmatprep.subr.mxu0 %v278_v2  ;;  %s3522_s7 = scalar_lea.vmem %s4429_s0, %s2823_s23  ;;  %2986 = vmatpush3.msra.mxu1 %v389_v4  ;;  %v384_v19 = vld [vmem:[%s4432_s3 + $0x8] sm:$0xff]  ;;  %v383_v20 = vld [vmem:[%s4432_s3] sm:$0xff]  ;;  %s2743_s14 = sshll.u32 %s4474_s13, 3  ;;  %v269_v38 = vld [vmem:[%s4433_s4 + $0x10] sm:$0xff]  ;;  %vm1664_vm14 = vcmask 15360   ;;  %vm1673_vm15 = vcmask 23552  }
  0x19   : > { %2964 = vmatpush3.msra.mxu0 %v278_v2  ;;  %v251_v8 = vld [vmem:[%s3522_s7] sm:$0xff]  ;;  %2987 = vmatprep.subr.mxu1 %v388_v7  ;;  %v252_v16 = vld [vmem:[%s3522_s7 + $0x10] sm:$0xff]  ;;  %s3566_s17 = scalar_lea.vmem %s4430_s1, %s2743_s14  ;;  %s3401_s23 = smov 96   ;;  %v270_v40 = vld [vmem:[%s4433_s4 + $0x18] sm:$0xff]  ;;  %vm1949_vm0 = vcmask 1043456  }
  0x1a   : > { %2965 = vmatprep.subr.mxu0 %v277_v5  ;;  %2977 = vmatprep.mubr.msk.f32.mxu0 %vm281_vm1, %v251_v8  ;;  %v253_v17 = vld [vmem:[%s3522_s7 + $0x20] sm:$0xff]  ;;  %v254_v18 = vld [vmem:[%s3522_s7 + $0x30] sm:$0xff]  ;;  %v3569_v21 = vld [vmem:[%s3566_s17 + $0x8] sm:$0xff]  ;;  %s3403_s13 = smov 32   ;;  %s3408_s14 = smov 124  }
  0x1b   : > { %2966 = vmatpush3.msra.mxu0 %v277_v5  ;;  %2988 = vmatpush3.msra.mxu1 %v388_v7  ;;  %v3590_v26 = vld [vmem:[%s3566_s17] sm:$0xff]  ;;  %v3601_v32 = vld [vmem:[%s3566_s17 + $0x18] sm:$0xff]  ;;  %v3607_v33 = vld [vmem:[%s3566_s17 + $0x28] sm:$0xff]  ;;  %vm1107_vm4 = vcmp.gt.f32.partialorder %v3569_v21, 0.5  ;;  %s3413_s9 = smov 66   ;;  %s3414_s11 = smov 34  }
  0x1c   : > { %2967 = vmatprep.subr.mxu0 %v276_v6  ;;  %2989 = vmatprep.subr.mxu1 %v387_v10  ;;  %v3610_v34 = vld [vmem:[%s3566_s17 + $0x10] sm:$0xff]  ;;  %v3619_v35 = vld [vmem:[%s3566_s17 + $0x20] sm:$0xff]  ;;  %v3628_v36 = vld [vmem:[%s3566_s17 + $0x38] sm:$0xff]  ;;  %vm1106_vm6 = vcmp.gt.f32.partialorder %v3590_v26, 0.5  ;;  %vm1109_vm7 = vcmp.gt.f32.partialorder %v3601_v32, 0.5  ;;  %vm1111_vm9 = vcmp.gt.f32.partialorder %v3607_v33, 0.5 }
  0x1d   : > { %2968 = vmatpush3.msra.mxu0 %v276_v6  ;;  %2990 = vmatpush3.msra.mxu1 %v387_v10  ;;  %v3639_v37 = vld [vmem:[%s3566_s17 + $0x30] sm:$0xff]  ;;  %v267_v39 = vld [vmem:[%s4433_s4] sm:$0xff]  ;;  %v268_v41 = vld [vmem:[%s4433_s4 + $0x8] sm:$0xff]  ;;  %vm1108_vm8 = vcmp.gt.f32.partialorder %v3610_v34, 0.5  ;;  %vm1110_vm10 = vcmp.gt.f32.partialorder %v3619_v35, 0.5  ;;  %vm1113_vm12 = vcmp.gt.f32.partialorder %v3628_v36, 0.5 }
  0x1e   : > { %2969 = vmatprep.subr.mxu0 %v275_v9  ;;  %2991 = vmatprep.subr.mxu1 %v386_v12  ;;  %vm1112_vm11 = vcmp.gt.f32.partialorder %v3639_v37, 0.5  ;;  %s3409_s17 = smov 28   ;;  %s3415_s12 = smov 62  }
  0x1f   : > { %2970 = vmatpush3.msra.mxu0 %v275_v9  ;;  %2992 = vmatpush3.msra.mxu1 %v386_v12 }
  0x20   : > { %2971 = vmatprep.subr.mxu0 %v274_v11  ;;  %2993 = vmatprep.subr.mxu1 %v385_v14 }
  0x21   : > { %2972 = vmatpush3.msra.mxu0 %v274_v11  ;;  %2994 = vmatpush3.msra.mxu1 %v385_v14 }
  0x22   : > { %2973 = vmatprep.subr.mxu0 %v273_v13  ;;  %2995 = vmatprep.subr.mxu1 %v384_v19 }
  0x23   : > { %2974 = vmatpush3.msra.mxu0 %v273_v13  ;;  %2996 = vmatpush3.msra.mxu1 %v384_v19 }
  0x24   : > { %2975 = vmatprep.subr.mxu0 %v272_v15  ;;  %2997 = vmatprep.subr.mxu1 %v383_v20 }
  0x25   : > { %2976 = vmatpush3.msra.mxu0 %v272_v15  ;;  %2998 = vmatpush3.msra.mxu1 %v383_v20 }
  0x26   : > { %2978 = vmatmul.mubr.msk.f32.vlgmr.msra.gmra.mxu0 %vm281_vm1, %v252_v16  ;;  %499 = vrot.lane.b32.xlu1 %v3569_v21, %s3401_s23 }
  0x27   : > { %2980 = vmatprep.mubr.msk.f32.mxu0 %vm281_vm1, %v253_v17  ;;  %497 = vrot.lane.b32.xlu0 %v3590_v26, %s3401_s23 }
  0x2a   : > { %2981 = vmatmul.mubr.msk.f32.gmra.mxu0 %vm281_vm1, %v254_v18  ;;  %vm1924_vm1 = vcmask 31744  }
  0x2b   : > { %3033 = vmatprep.mubr.msk.f32.mxu0 %vm529_vm3, %v3590_v26 }
  0x98   : > { %v500_v42 = vpop.permute.xlu1 %499 }
  0x99   : > { %v498_v27 = vpop.permute.xlu0 %497 }
  0xe6   : > { %v3573_v22 = vpop.f32.mrf.mxu0 }
  0xe7   : > { %4447 = vst [vmem:[#allocation5_spill] sm:$0xff] %v3573_v22 }
  0xe8   : > { %v3575_v23 = vpop.f32.mrf.mxu0 }
  0xe9   : > { %4448 = vst [vmem:[#allocation6_spill] sm:$0xff] %v3575_v23  ;;  %2999 = vmatprep.mubr.msk.f32.mxu1 %vm391_vm2, %v3575_v23 }
  0xea   : > { %v3579_v24 = vpop.f32.mrf.mxu0  ;;  %3000 = vmatmul.mubr.msk.f32.vlgmr.msra.gmra.mxu1 %vm391_vm2, %v3573_v22 }
  0xec   : > { %v3583_v25 = vpop.f32.mrf.mxu0 }
  0xed   : > { %3002 = vmatprep.mubr.msk.f32.mxu1 %vm391_vm2, %v3583_v25 }
  0xee   : > { %3003 = vmatmul.mubr.msk.f32.gmra.mxu1 %vm391_vm2, %v3579_v24 }
  0xef   : > { %3013 = vmatprep.mubr.msk.f32.mxu1 %vm529_vm3, %v498_v27 }
 0x1aa   : > { %v3001_v28 = vpop.f32.mrf.mxu1 }
 0x1ab   : > { %519 = vrot.lane.b32.xlu1 %v3001_v28, %s3402_s25 }
 0x1ac   : > { %v470_v29 = vpop.f32.mrf.mxu1 }
 0x1ae   : > { %v3004_v30 = vpop.f32.mrf.mxu1 }
 0x1af   : > { %517 = vrot.lane.b32.xlu1 %v470_v29, %s3402_s25  ;;  %523 = vrot.lane.b32.xlu0 %v3004_v30, %s3402_s25 }
 0x1b0   : > { %3025 = vmatprep.subr.mxu0 %v3004_v30  ;;  %v480_v31 = vpop.f32.mrf.mxu1 }
 0x1b1   : > { %3026 = vmatpush3.msra.mxu0 %v3004_v30 }
 0x1b2   : > { %3027 = vmatprep.subr.mxu0 %v480_v31 }
 0x1b3   : > { %3028 = vmatpush3.msra.mxu0 %v480_v31  ;;  %503 = vrot.lane.b32.xlu1 %v3601_v32, %s3401_s23 }
 0x1b4   : > { %521 = vrot.lane.b32.xlu0 %v480_v31, %s3402_s25  ;;  %3029 = vmatprep.subr.mxu0 %v3001_v28 }
 0x1b5   : > { %3030 = vmatpush3.msra.mxu0 %v3001_v28 }
 0x1b6   : > { %3031 = vmatprep.subr.mxu0 %v470_v29 }
 0x1b7   : > { %3032 = vmatpush3.msra.mxu0 %v470_v29  ;;  %507 = vrot.lane.b32.xlu1 %v3607_v33, %s3401_s23 }
 0x1b8   : > { %501 = vrot.lane.b32.xlu0 %v3610_v34, %s3401_s23  ;;  %3034 = vmatmul.mubr.msk.f32.vlgmr.msra.gmra.mxu0 %vm529_vm3, %v3569_v21 }
 0x1b9   : > { %3036 = vmatprep.mubr.msk.f32.mxu0 %vm529_vm3, %v3610_v34 }
 0x1bb   : > { %792 = vrot.lane.b32.xlu1 %v3583_v25, %s3402_s25 }
 0x1bc   : > { %505 = vrot.lane.b32.xlu0 %v3619_v35, %s3401_s23  ;;  %3037 = vmatmul.mubr.msk.f32.gmra.mxu0 %vm529_vm3, %v3601_v32 }
 0x1bd   : > { %3039 = vmatprep.mubr.msk.f32.mxu0 %vm529_vm3, %v3619_v35 }
 0x1bf   : > { %511 = vrot.lane.b32.xlu1 %v3628_v36, %s3401_s23 }
 0x1c0   : > { %794 = vrot.lane.b32.xlu0 %v3579_v24, %s3402_s25  ;;  %3040 = vmatmul.mubr.msk.f32.gmra.mxu0 %vm529_vm3, %v3607_v33 }
 0x1c1   : > { %3042 = vmatprep.mubr.msk.f32.mxu0 %vm529_vm3, %v3639_v37 }
 0x1c3   : > { %788 = vrot.lane.b32.xlu1 %v3575_v23, %s3402_s25 }
 0x1c4   : > { %509 = vrot.lane.b32.xlu0 %v3639_v37, %s3401_s23  ;;  %3043 = vmatmul.mubr.msk.f32.gmra.mxu0 %vm529_vm3, %v3628_v36 }
 0x1c7   : > { %774 = vrot.lane.b32.xlu1 %v3569_v21, %s3402_s25 }
 0x1c8   : > { %790 = vrot.lane.b32.xlu0 %v3573_v22, %s3402_s25 }
 0x1cb   : > { %778 = vrot.lane.b32.xlu1 %v3601_v32, %s3402_s25 }
 0x1cc   : > { %772 = vrot.lane.b32.xlu0 %v3590_v26, %s3402_s25 }
 0x1cf   : > { %782 = vrot.lane.b32.xlu1 %v3607_v33, %s3402_s25 }
 0x1d0   : > { %776 = vrot.lane.b32.xlu0 %v3610_v34, %s3402_s25 }
 0x1d3   : > { %786 = vrot.lane.b32.xlu1 %v3628_v36, %s3402_s25 }
 0x1d4   : > { %780 = vrot.lane.b32.xlu0 %v3619_v35, %s3402_s25 }
 0x1d7   : > { %937 = vrot.lane.b32.xlu1 %v269_v38, %s3402_s25 }
 0x1d8   : > { %784 = vrot.lane.b32.xlu0 %v3639_v37, %s3402_s25 }
 0x1db   : > { %933 = vrot.lane.b32.xlu1 %v267_v39, %s3402_s25 }
 0x1dc   : > { %939 = vrot.lane.b32.xlu0 %v270_v40, %s3402_s25 }
 0x1df   : > { %1076 = vrot.lane.b32.xlu1 %v3569_v21, %s3403_s13 }
 0x1e0   : > { %935 = vrot.lane.b32.xlu0 %v268_v41, %s3402_s25 }
 0x1e3   : > { %1080 = vrot.lane.b32.xlu1 %v3601_v32, %s3403_s13 }
 0x1e4   : > { %1074 = vrot.lane.b32.xlu0 %v3590_v26, %s3403_s13 }
 0x1e7   : > { %1084 = vrot.lane.b32.xlu1 %v3607_v33, %s3403_s13 }
 0x1e8   : > { %1078 = vrot.lane.b32.xlu0 %v3610_v34, %s3403_s13 }
 0x1eb   : > { %1088 = vrot.lane.b32.xlu1 %v3628_v36, %s3403_s13 }
 0x1ec   : > { %1082 = vrot.lane.b32.xlu0 %v3619_v35, %s3403_s13 }
 0x1f0   : > { %1086 = vrot.lane.b32.xlu0 %v3639_v37, %s3403_s13 }
 0x21d   : > { %v520_v43 = vpop.permute.xlu1 %519 }
 0x221   : > { %v518_v44 = vpop.permute.xlu1 %517  ;;  %v524_v45 = vpop.permute.xlu0 %523 }
 0x222   : > { %3005 = vmatprep.subr.mxu1 %v524_v45 }
 0x223   : > { %3006 = vmatpush3.msra.mxu1 %v524_v45 }
 0x225   : > { %v504_v46 = vpop.permute.xlu1 %503 }
 0x226   : > { %v522_v47 = vpop.permute.xlu0 %521 }
 0x227   : > { %3007 = vmatprep.subr.mxu1 %v522_v47 }
 0x228   : > { %3008 = vmatpush3.msra.mxu1 %v522_v47 }
 0x229   : > { %3009 = vmatprep.subr.mxu1 %v520_v43  ;;  %v508_v48 = vpop.permute.xlu1 %507 }
 0x22a   : > { %3010 = vmatpush3.msra.mxu1 %v520_v43  ;;  %v502_v49 = vpop.permute.xlu0 %501 }
 0x22b   : > { %3011 = vmatprep.subr.mxu1 %v518_v44 }
 0x22c   : > { %3012 = vmatpush3.msra.mxu1 %v518_v44 }
 0x22d   : > { %3014 = vmatmul.mubr.msk.f32.vlgmr.msra.gmra.mxu1 %vm529_vm3, %v500_v42  ;;  %v793_v50 = vpop.permute.xlu1 %792 }
 0x22e   : > { %3016 = vmatprep.mubr.msk.f32.mxu1 %vm529_vm3, %v502_v49  ;;  %v506_v51 = vpop.permute.xlu0 %505 }
 0x231   : > { %3017 = vmatmul.mubr.msk.f32.gmra.mxu1 %vm529_vm3, %v504_v46  ;;  %v512_v52 = vpop.permute.xlu1 %511 }
 0x232   : > { %3019 = vmatprep.mubr.msk.f32.mxu1 %vm529_vm3, %v506_v51  ;;  %v795_v53 = vpop.permute.xlu0 %794 }
 0x233   : > { %3045 = vmatprep.subr.mxu1 %v795_v53 }
 0x234   : > { %3046 = vmatpush3.msra.mxu1 %v795_v53 }
 0x235   : > { %3020 = vmatmul.mubr.msk.f32.gmra.mxu1 %vm529_vm3, %v508_v48  ;;  %3047 = vmatprep.subr.mxu1 %v793_v50  ;;  %v789_v54 = vpop.permute.xlu1 %788 }
 0x236   : > { %3048 = vmatpush3.msra.mxu1 %v793_v50  ;;  %v510_v55 = vpop.permute.xlu0 %509 }
 0x237   : > { %3022 = vmatprep.mubr.msk.f32.mxu1 %vm529_vm3, %v510_v55 }
 0x239   : > { %3023 = vmatmul.mubr.msk.f32.gmra.mxu1 %vm529_vm3, %v512_v52  ;;  %v3692_v56 = vpop.permute.xlu1 %774 }
 0x23a   : > { %v791_v57 = vpop.permute.xlu0 %790 }
 0x23b   : > { %3049 = vmatprep.subr.mxu1 %v791_v57 }
 0x23c   : > { %3050 = vmatpush3.msra.mxu1 %v791_v57 }
 0x23d   : > { %3051 = vmatprep.subr.mxu1 %v789_v54  ;;  %v3694_v58 = vpop.permute.xlu1 %778 }
 0x23e   : > { %3052 = vmatpush3.msra.mxu1 %v789_v54  ;;  %v3696_v59 = vpop.permute.xlu0 %772 }
 0x23f   : > { %3053 = vmatprep.mubr.msk.f32.mxu1 %vm529_vm3, %v3696_v59 }
 0x240   : > { %3054 = vmatmul.mubr.msk.f32.vlgmr.msra.gmra.mxu1 %vm529_vm3, %v3692_v56 }
 0x241   : > { %v3706_v61 = vpop.permute.xlu1 %782 }
 0x242   : > { %v3702_v60 = vpop.permute.xlu0 %776 }
 0x243   : > { %3056 = vmatprep.mubr.msk.f32.mxu1 %vm529_vm3, %v3702_v60 }
 0x244   : > { %3057 = vmatmul.mubr.msk.f32.gmra.mxu1 %vm529_vm3, %v3694_v58 }
 0x245   : > { %v3716_v63 = vpop.permute.xlu1 %786 }
 0x246   : > { %v3710_v62 = vpop.permute.xlu0 %780 }
 0x247   : > { %3059 = vmatprep.mubr.msk.f32.mxu1 %vm529_vm3, %v3710_v62 }
 0x248   : > { %3060 = vmatmul.mubr.msk.f32.gmra.mxu1 %vm529_vm3, %v3706_v61 }
 0x249   : > { %v938_v2 = vpop.permute.xlu1 %937 }
 0x24a   : > { %v3718_v0 = vpop.permute.xlu0 %784 }
 0x24b   : > { %3062 = vmatprep.mubr.msk.f32.mxu1 %vm529_vm3, %v3718_v0 }
 0x24c   : > { %3063 = vmatmul.mubr.msk.f32.gmra.mxu1 %vm529_vm3, %v3716_v63 }
 0x24d   : > { %v934_v4 = vpop.permute.xlu1 %933 }
 0x24e   : > { %v940_v1 = vpop.permute.xlu0 %939 }
 0x24f   : > { %3065 = vmatprep.subr.mxu0 %v940_v1 }
 0x250   : > { %3066 = vmatpush3.msra.mxu0 %v940_v1  ;;  %v3404_v1 = vmov 1  }
 0x251   : > { %3067 = vmatprep.subr.mxu0 %v938_v2  ;;  %3248 = vset.pattern.permute.xlu0 %v3404_v1 }
 0x252   : > { %v936_v3 = vpop.permute.xlu0 %935  ;;  %3068 = vmatpush3.msra.mxu0 %v938_v2  ;;  %v3405_v2 = vmov 0  }
 0x253   : > { %3069 = vmatprep.subr.mxu0 %v936_v3  ;;  %3247 = vset.pattern.permute.xlu1 %v3405_v2 }
 0x254   : > { %3070 = vmatpush3.msra.mxu0 %v936_v3  ;;  %v1077_v3 = vpop.permute.xlu1 %1076 }
 0x255   : > { %3071 = vmatprep.subr.mxu0 %v934_v4 }
 0x256   : > { %3072 = vmatpush3.msra.mxu0 %v934_v4 }
 0x278   : > { %v3035_v6 = vpop.f32.mrf.mxu0 }
 0x27a   : > { %v733_v9 = vpop.f32.mrf.mxu0 }
 0x27c   : > { %v3038_v12 = vpop.f32.mrf.mxu0 }
 0x27e   : > { %v743_v14 = vpop.f32.mrf.mxu0 }
 0x280   : > { %v3041_v16 = vpop.f32.mrf.mxu0 }
 0x282   : > { %v753_v27 = vpop.f32.mrf.mxu0 }
 0x284   : > { %v3044_v40 = vpop.f32.mrf.mxu0 }
 0x286   : > { %v763_v47 = vpop.f32.mrf.mxu0 }
 0x2ed   : > { %v3015_v5 = vpop.f32.mrf.mxu1 }
 0x2ee   : > { %v3742_v20 = vadd.f32 %v3035_v6, %v3015_v5  ;;  %v3406_v6 = vmov 3  }
 0x2ef   : > { %v612_v7 = vpop.f32.mrf.mxu1 }
 0x2f0   : > { %v3740_v19 = vadd.f32 %v733_v9, %v612_v7  ;;  %4450 = vst [vmem:[#allocation8_spill] sm:$0xff] %v3742_v20  ;;  %v3407_v7 = vmov 2  }
 0x2f1   : > { %v3018_v8 = vpop.f32.mrf.mxu1 }
 0x2f2   : > { %4449 = vst [vmem:[#allocation7_spill] sm:$0xff] %v3740_v19  ;;  %v3749_v39 = vadd.f32 %v3038_v12, %v3018_v8 }
 0x2f3   : > { %v622_v10 = vpop.f32.mrf.mxu1 }
 0x2f4   : > { %v3746_v38 = vadd.f32 %v743_v14, %v622_v10  ;;  %4452 = vst [vmem:[#allocation10_spill] sm:$0xff] %v3749_v39  ;;  %v1081_v10 = vpop.permute.xlu1 %1080 }
 0x2f5   : > { %v3021_v11 = vpop.f32.mrf.mxu1 }
 0x2f6   : > { %4451 = vst [vmem:[#allocation9_spill] sm:$0xff] %v3746_v38  ;;  %v3757_v46 = vadd.f32 %v3041_v16, %v3021_v11 }
 0x2f7   : > { %v632_v13 = vpop.f32.mrf.mxu1 }
 0x2f8   : > { %v3754_v45 = vadd.f32 %v753_v27, %v632_v13  ;;  %4454 = vst [vmem:[#allocation12_spill] sm:$0xff] %v3757_v46 }
 0x2f9   : > { %v3024_v15 = vpop.f32.mrf.mxu1 }
 0x2fa   : > { %4453 = vst [vmem:[#allocation11_spill] sm:$0xff] %v3754_v45  ;;  %v3765_v53 = vadd.f32 %v3044_v40, %v3024_v15  ;;  %v1085_v15 = vpop.permute.xlu1 %1084 }
 0x2fb   : > { %v642_v17 = vpop.f32.mrf.mxu1 }
 0x2fc   : > { %v3762_v52 = vadd.f32 %v763_v47, %v642_v17  ;;  %4456 = vst [vmem:[#allocation14_spill] sm:$0xff] %v3765_v53 }
 0x2fe   : > { %4455 = vst [vmem:[#allocation13_spill] sm:$0xff] %v3762_v52 }
 0x300   : > { %v3055_v18 = vpop.f32.mrf.mxu1 }
 0x301   : > { %v922_v30 = vmul.f32 %v3055_v18, %v3742_v20 }
 0x302   : > { %v882_v28 = vpop.f32.mrf.mxu1 }
 0x303   : > { %v921_v29 = vmul.f32 %v882_v28, %v3740_v19 }
 0x304   : > { %v3058_v31 = vpop.f32.mrf.mxu1 }
 0x305   : > { %3073 = vmatprep.mubr.msk.f32.mxu0 %vm529_vm3, %v921_v29  ;;  %v924_v43 = vmul.f32 %v3058_v31, %v3749_v39 }
 0x306   : > { %v892_v41 = vpop.f32.mrf.mxu1  ;;  %3074 = vmatmul.mubr.msk.f32.vlgmr.msra.gmra.mxu0 %vm529_vm3, %v922_v30  ;;  %v1089_v30 = vpop.permute.xlu1 %1088 }
 0x307   : > { %v923_v42 = vmul.f32 %v892_v41, %v3746_v38 }
 0x308   : > { %v3061_v44 = vpop.f32.mrf.mxu1 }
 0x309   : > { %3076 = vmatprep.mubr.msk.f32.mxu0 %vm529_vm3, %v923_v42  ;;  %v926_v50 = vmul.f32 %v3061_v44, %v3757_v46 }
 0x30a   : > { %v902_v48 = vpop.f32.mrf.mxu1  ;;  %3077 = vmatmul.mubr.msk.f32.gmra.mxu0 %vm529_vm3, %v924_v43 }
 0x30b   : > { %v925_v49 = vmul.f32 %v902_v48, %v3754_v45 }
 0x30c   : > { %v3064_v51 = vpop.f32.mrf.mxu1 }
 0x30d   : > { %3079 = vmatprep.mubr.msk.f32.mxu0 %vm529_vm3, %v925_v49  ;;  %v928_v57 = vmul.f32 %v3064_v51, %v3765_v53 }
 0x30e   : > { %v912_v54 = vpop.f32.mrf.mxu1  ;;  %3080 = vmatmul.mubr.msk.f32.gmra.mxu0 %vm529_vm3, %v926_v50 }
 0x30f   : > { %v927_v55 = vmul.f32 %v912_v54, %v3762_v52 }
 0x311   : > { %3082 = vmatprep.mubr.msk.f32.mxu0 %vm529_vm3, %v927_v55 }
 0x312   : > { %3083 = vmatmul.mubr.msk.f32.gmra.mxu0 %vm529_vm3, %v928_v57 }
 0x313   : > { %3115 = vmatprep.mubr.msk.f32.mxu0 %vm529_vm3, %v3696_v59  ;;  %v1075_v59 = vpop.permute.xlu0 %1074 }
 0x317   : > { %v1079_v14 = vpop.permute.xlu0 %1078 }
 0x31b   : > { %v1083_v27 = vpop.permute.xlu0 %1082 }
 0x31f   : > { %v1087_v41 = vpop.permute.xlu0 %1086 }
 0x3c6   : > { %v3075_v4 = vpop.f32.mrf.mxu0 }
 0x3c7   : > { %v3776_v5 = vmul.f32 %v3075_v4, %v1077_v3 }
 0x3c8   : > { %v1035_v8 = vpop.f32.mrf.mxu0 }
 0x3c9   : > { %1261 = vperm.xlu0 %3248, %v3776_v5   ;;  %1121 = vperm.xlu1 %3247, %v3776_v5   ;;  %v3784_v9 = vmul.f32 %v1075_v59, %v1035_v8 }
 0x3ca   : > { %v3078_v11 = vpop.f32.mrf.mxu0 }
 0x3cb   : > { %v3794_v12 = vmul.f32 %v3078_v11, %v1081_v10 }
 0x3cc   : > { %v1045_v13 = vpop.f32.mrf.mxu0 }
 0x3cd   : > { %3250 = vset.pattern.permute.xlu0 %v3406_v6  ;;  %3249 = vset.pattern.permute.xlu1 %v3407_v7  ;;  %v3804_v17 = vmul.f32 %v1079_v14, %v1045_v13 }
 0x3ce   : > { %1527 = vperm.xlu0 %3250, %v3776_v5   ;;  %1394 = vperm.xlu1 %3249, %v3776_v5   ;;  %v3081_v16 = vpop.f32.mrf.mxu0 }
 0x3cf   : > { %v3806_v18 = vmul.f32 %v3081_v16, %v1085_v15 }
 0x3d0   : > { %v1055_v28 = vpop.f32.mrf.mxu0 }
 0x3d1   : > { %v3816_v29 = vmul.f32 %v1083_v27, %v1055_v28 }
 0x3d2   : > { %3251 = vset.pattern.permute.xlu0 %v3405_v2  ;;  %3252 = vset.pattern.permute.xlu1 %v3404_v1  ;;  %v3084_v31 = vpop.f32.mrf.mxu0 }
 0x3d3   : > { %1257 = vperm.xlu1 %3252, %v3784_v9   ;;  %1116 = vperm.xlu0 %3251, %v3784_v9   ;;  %v3826_v40 = vmul.f32 %v3084_v31, %v1089_v30 }
 0x3d4   : > { %v1065_v42 = vpop.f32.mrf.mxu0 }
 0x3d5   : > { %v3836_v43 = vmul.f32 %v1087_v41, %v1065_v42 }
 0x3d7   : > { %3254 = vset.pattern.permute.xlu1 %v3406_v6  ;;  %3253 = vset.pattern.permute.xlu0 %v3407_v7 }
 0x3d8   : > { %1523 = vperm.xlu1 %3254, %v3784_v9   ;;  %1390 = vperm.xlu0 %3253, %v3784_v9  }
 0x3dc   : > { %3256 = vset.pattern.permute.xlu1 %v3404_v1  ;;  %3255 = vset.pattern.permute.xlu0 %v3405_v2 }
 0x3dd   : > { %1269 = vperm.xlu1 %3256, %v3794_v12   ;;  %1131 = vperm.xlu0 %3255, %v3794_v12  }
 0x3e1   : > { %3258 = vset.pattern.permute.xlu1 %v3406_v6  ;;  %3257 = vset.pattern.permute.xlu0 %v3407_v7 }
 0x3e2   : > { %1535 = vperm.xlu1 %3258, %v3794_v12   ;;  %1402 = vperm.xlu0 %3257, %v3794_v12  }
 0x3e6   : > { %3259 = vset.pattern.permute.xlu1 %v3405_v2  ;;  %3263 = vset.pattern.permute.xlu0 %v3405_v2 }
 0x3e7   : > { %1126 = vperm.xlu1 %3259, %v3804_v17   ;;  %1141 = vperm.xlu0 %3263, %v3806_v18  }
 0x3eb   : > { %3260 = vset.pattern.permute.xlu1 %v3404_v1  ;;  %3265 = vset.pattern.permute.xlu0 %v3407_v7 }
 0x3ec   : > { %1265 = vperm.xlu1 %3260, %v3804_v17   ;;  %1410 = vperm.xlu0 %3265, %v3806_v18  }
 0x3f0   : > { %3261 = vset.pattern.permute.xlu1 %v3407_v7  ;;  %3268 = vset.pattern.permute.xlu0 %v3404_v1 }
 0x3f1   : > { %1398 = vperm.xlu1 %3261, %v3804_v17   ;;  %1273 = vperm.xlu0 %3268, %v3816_v29  }
 0x3f5   : > { %3262 = vset.pattern.permute.xlu1 %v3406_v6  ;;  %3270 = vset.pattern.permute.xlu0 %v3406_v6 }
 0x3f6   : > { %1531 = vperm.xlu1 %3262, %v3804_v17   ;;  %1539 = vperm.xlu0 %3270, %v3816_v29  }
 0x3fa   : > { %3264 = vset.pattern.permute.xlu1 %v3404_v1  ;;  %3271 = vset.pattern.permute.xlu0 %v3405_v2 }
 0x3fb   : > { %1277 = vperm.xlu1 %3264, %v3806_v18   ;;  %1151 = vperm.xlu0 %3271, %v3826_v40  }
 0x3ff   : > { %3266 = vset.pattern.permute.xlu1 %v3406_v6  ;;  %3273 = vset.pattern.permute.xlu0 %v3407_v7 }
 0x400   : > { %1543 = vperm.xlu1 %3266, %v3806_v18   ;;  %1418 = vperm.xlu0 %3273, %v3826_v40  }
 0x404   : > { %3267 = vset.pattern.permute.xlu1 %v3405_v2  ;;  %3275 = vset.pattern.permute.xlu0 %v3404_v1 }
 0x405   : > { %1136 = vperm.xlu1 %3267, %v3816_v29   ;;  %1281 = vperm.xlu0 %3275, %v3836_v43  }
 0x409   : > { %3269 = vset.pattern.permute.xlu1 %v3407_v7  ;;  %3277 = vset.pattern.permute.xlu0 %v3406_v6 }
 0x40a   : > { %1406 = vperm.xlu1 %3269, %v3816_v29   ;;  %1547 = vperm.xlu0 %3277, %v3836_v43  }
 0x40e   : > { %3272 = vset.pattern.permute.xlu1 %v3404_v1 }
 0x40f   : > { %1285 = vperm.xlu1 %3272, %v3826_v40  }
 0x413   : > { %3274 = vset.pattern.permute.xlu1 %v3405_v2 }
 0x414   : > { %1146 = vperm.xlu1 %3274, %v3836_v43  }
 0x418   : > { %3276 = vset.pattern.permute.xlu1 %v3407_v7 }
 0x419   : > { %1414 = vperm.xlu1 %3276, %v3836_v43  }
 0x41d   : > { %3278 = vset.pattern.permute.xlu1 %v3406_v6 }
 0x41e   : > { %1551 = vperm.xlu1 %3278, %v3826_v40  }
 0x444   : > { %v1262_v44 = vpop.permute.xlu0 %1261  ;;  %v1122_v47 = vpop.permute.xlu1 %1121 }
 0x445   : > { %v1289_v30 = vsel %vm1107_vm4, %v1262_v44, -1e+30  ;;  %v1155_v31 = vsel %vm1107_vm4, %v1122_v47, -1e+30 }
 0x446   : > { %v1297_v38 = vsel %vm1162_vm5, %v1289_v30, -inf }
 0x449   : > { %v1528_v48 = vpop.permute.xlu0 %1527  ;;  %v1395_v49 = vpop.permute.xlu1 %1394 }
 0x44a   : > { %v1555_v41 = vsel %vm1107_vm4, %v1528_v48, -1e+30  ;;  %v1422_v19 = vsel %vm1107_vm4, %v1395_v49, -1e+30  ;;  %v1164_v48 = vsel %vm1162_vm5, %v1155_v31, -inf  ;;  %vm2114_vm4 = vcmask 228352  }
 0x44b   : > { %v3889_v49 = vsel %vm1162_vm5, %v1555_v41, -inf  ;;  %v3896_v30 = vsel %vm1162_vm5, %v1422_v19, -inf }
 0x44e   : > { %v1258_v50 = vpop.permute.xlu1 %1257  ;;  %v1117_v51 = vpop.permute.xlu0 %1116 }
 0x44f   : > { %v1288_v52 = vsel %vm1106_vm6, %v1258_v50, -1e+30  ;;  %v1154_v23 = vsel %vm1106_vm6, %v1117_v51, -1e+30 }
 0x450   : > { %v1296_v51 = vsel %vm1162_vm5, %v1288_v52, -inf  ;;  %v1163_v31 = vsel %vm1162_vm5, %v1154_v23, -inf }
 0x453   : > { %v1524_v54 = vpop.permute.xlu1 %1523  ;;  %v1391_v55 = vpop.permute.xlu0 %1390 }
 0x454   : > { %v1421_v47 = vsel %vm1106_vm6, %v1391_v55, -1e+30  ;;  %v3905_v41 = vsel %vm1106_vm6, %v1524_v54, -1e+30 }
 0x458   : > { %v1270_v57 = vpop.permute.xlu1 %1269  ;;  %v1132_v1 = vpop.permute.xlu0 %1131 }
 0x459   : > { %v1291_v55 = vsel %vm1109_vm7, %v1270_v57, -1e+30  ;;  %v1157_v52 = vsel %vm1109_vm7, %v1132_v1, -1e+30 }
 0x45a   : > { %v1299_v54 = vsel %vm1162_vm5, %v1291_v55, -inf }
 0x45d   : > { %v3854_v2 = vpop.permute.xlu1 %1535  ;;  %v3856_v3 = vpop.permute.xlu0 %1402 }
 0x462   : > { %v3858_v4 = vpop.permute.xlu1 %1126  ;;  %v1142_v7 = vpop.permute.xlu0 %1141 }
 0x467   : > { %v1266_v6 = vpop.permute.xlu1 %1265  ;;  %v1411_v59 = vpop.permute.xlu0 %1410 }
 0x468   : > { %v1290_v19 = vsel %vm1108_vm8, %v1266_v6, -1e+30  ;;  %v1426_v1 = vsel %vm1111_vm9, %v1411_v59, -1e+30 }
 0x469   : > { %v1298_v53 = vsel %vm1162_vm5, %v1290_v19, -inf }
 0x46c   : > { %v3860_v8 = vpop.permute.xlu1 %1398  ;;  %v1274_v10 = vpop.permute.xlu0 %1273 }
 0x46d   : > { %v1292_v50 = vsel %vm1110_vm10, %v1274_v10, -1e+30  ;;  %v3908_v10 = vsel %vm1162_vm5, %v1421_v47, -inf  ;;  %v1159_v47 = vsel %vm1111_vm9, %v1142_v7, -1e+30 }
 0x46e   : > { %v1156_v7 = vsel %vm1108_vm8, %v3858_v4, -1e+30  ;;  %v1169_v59 = vsel %vm1162_vm5, %v1159_v47, -inf }
 0x471   : > { %v3862_v11 = vpop.permute.xlu1 %1531  ;;  %v3864_v13 = vpop.permute.xlu0 %1539 }
 0x476   : > { %v1278_v14 = vpop.permute.xlu1 %1277  ;;  %v1152_v15 = vpop.permute.xlu0 %1151 }
 0x477   : > { %v1293_v44 = vsel %vm1111_vm9, %v1278_v14, -1e+30 }
 0x478   : > { %v1302_v39 = vsel %vm1162_vm5, %v1293_v44, -inf }
 0x479   : > { %v1303_v20 = vmax.f32 %v1297_v38, %v1302_v39  ;;  %v1166_v38 = vsel %vm1162_vm5, %v1157_v52, -inf  ;;  %v1557_v39 = vsel %vm1109_vm7, %v3854_v2, -1e+30  ;;  %v1424_v52 = vsel %vm1109_vm7, %v3856_v3, -1e+30 }
 0x47a   : > { %v1435_v2 = vsel %vm1162_vm5, %v1426_v1, -inf  ;;  %v1432_v47 = vsel %vm1162_vm5, %v1424_v52, -inf }
 0x47b   : > { %v3866_v16 = vpop.permute.xlu1 %1543  ;;  %v3868_v27 = vpop.permute.xlu0 %1418 }
 0x480   : > { %v1137_v28 = vpop.permute.xlu1 %1136  ;;  %v1282_v42 = vpop.permute.xlu0 %1281 }
 0x481   : > { %v1294_v14 = vsel %vm1112_vm11, %v1282_v42, -1e+30  ;;  %v1300_v42 = vsel %vm1162_vm5, %v1292_v50, -inf  ;;  %v1158_v57 = vsel %vm1110_vm10, %v1137_v28, -1e+30 }
 0x482   : > { %v1304_v23 = vsel %vm1162_vm5, %v1294_v14, -inf  ;;  %v1161_v28 = vsel %vm1113_vm12, %v1152_v15, -1e+30  ;;  %v1301_v14 = vmax.f32 %v1296_v51, %v1300_v42  ;;  %v1167_v55 = vsel %vm1162_vm5, %v1158_v57, -inf }
 0x483   : > { %v1305_v46 = vmax.f32 %v1298_v53, %v1304_v23  ;;  %v1173_v19 = vsel %vm1162_vm5, %v1161_v28, -inf  ;;  %v1168_v57 = vmax.f32 %v1163_v31, %v1167_v55  ;;  %v1165_v23 = vsel %vm1162_vm5, %v1156_v7, -inf }
 0x484   : > { %v1308_v15 = vmax.f32 %v1301_v14, %v1303_v20  ;;  %v1428_v20 = vsel %vm1113_vm12, %v3868_v27, -1e+30  ;;  %v1436_v31 = vmax.f32 %v3896_v30, %v1435_v2  ;;  %v1559_v27 = vsel %vm1111_vm9, %v3866_v16, -1e+30 }
 0x485   : > { %v1407_v45 = vpop.permute.xlu1 %1406  ;;  %v1548_v1 = vpop.permute.xlu0 %1547 }
 0x486   : > { %v1425_v51 = vsel %vm1110_vm10, %v1407_v45, -1e+30  ;;  %v1170_v45 = vmax.f32 %v1164_v48, %v1169_v59  ;;  %v1439_v48 = vsel %vm1162_vm5, %v1428_v20, -inf  ;;  %v1560_v16 = vsel %vm1112_vm11, %v1548_v1, -1e+30 }
 0x48a   : > { %v1286_v44 = vpop.permute.xlu1 %1285 }
 0x48b   : > { %v1295_v6 = vsel %vm1113_vm12, %v1286_v44, -1e+30 }
 0x48c   : > { %v1306_v50 = vsel %vm1162_vm5, %v1295_v6, -inf  ;;  %v1423_v6 = vsel %vm1108_vm8, %v3860_v8, -1e+30 }
 0x48d   : > { %v1307_v22 = vmax.f32 %v1299_v54, %v1306_v50  ;;  %v1433_v54 = vsel %vm1162_vm5, %v1425_v51, -inf  ;;  %v1175_v50 = vmax.f32 %v1168_v57, %v1170_v45  ;;  %v1431_v59 = vsel %vm1162_vm5, %v1423_v6, -inf }
 0x48e   : > { %v1434_v30 = vmax.f32 %v3908_v10, %v1433_v54  ;;  %v1568_v51 = vsel %vm1162_vm5, %v1559_v27, -inf  ;;  %v1556_v10 = vsel %vm1108_vm8, %v3862_v11, -1e+30  ;;  %v1565_v45 = vsel %vm1162_vm5, %v1557_v39, -inf }
 0x48f   : > { %v1309_v53 = vmax.f32 %v1305_v46, %v1307_v22  ;;  %v1147_v42 = vpop.permute.xlu1 %1146  ;;  %v1174_v46 = vmax.f32 %v1166_v38, %v1173_v19  ;;  %v1558_v38 = vsel %vm1110_vm10, %v3864_v13, -1e+30  ;;  %v1562_v13 = vsel %vm1162_vm5, %v3905_v41, -inf }
 0x490   : > { %v1160_v4 = vsel %vm1112_vm11, %v1147_v42, -1e+30  ;;  %v1566_v2 = vsel %vm1162_vm5, %v1558_v38, -inf }
 0x491   : > { %v1310_v44 = vmax.f32 %v1308_v15, %v1309_v53  ;;  %v1171_v22 = vsel %vm1162_vm5, %v1160_v4, -inf  ;;  %v1440_v53 = vmax.f32 %v1432_v47, %v1439_v48  ;;  %v1441_v4 = vmax.f32 %v1434_v30, %v1436_v31 }
 0x492   : > { %v1172_v3 = vmax.f32 %v1165_v23, %v1171_v22  ;;  %v1570_v23 = vsel %vm1162_vm5, %v1560_v16, -inf  ;;  %v1567_v31 = vmax.f32 %v1562_v13, %v1566_v2 }
 0x493   : > { %v1311_v28 = vrot.slane %v1310_v44, 4 }
 0x494   : > { %v1176_v14 = vmax.f32 %v1172_v3, %v1174_v46  ;;  %v1415_v55 = vpop.permute.xlu1 %1414  ;;  %v1569_v46 = vmax.f32 %v3889_v49, %v1568_v51  ;;  %v1564_v3 = vsel %vm1162_vm5, %v1556_v10, -inf }
 0x495   : > { %v1312_v7 = vmax.f32 %v1310_v44, %v1311_v28  ;;  %v1427_v8 = vsel %vm1112_vm11, %v1415_v55, -1e+30  ;;  %v1571_v1 = vmax.f32 %v1564_v3, %v1570_v23 }
 0x496   : > { %v1177_v15 = vmax.f32 %v1175_v50, %v1176_v14  ;;  %v1437_v19 = vsel %vm1162_vm5, %v1427_v8, -inf  ;;  %v1574_v39 = vmax.f32 %v1567_v31, %v1569_v46 }
 0x497   : > { %v1313_v42 = vrot.slane %v1312_v7, 2  ;;  %v1438_v52 = vmax.f32 %v1431_v59, %v1437_v19 }
 0x498   : > { %v1178_v57 = vrot.slane %v1177_v15, 4 }
 0x499   : > { %v1314_v20 = vmax.f32 %v1312_v7, %v1313_v42  ;;  %v1442_v44 = vmax.f32 %v1438_v52, %v1440_v53  ;;  %v1552_v22 = vpop.permute.xlu1 %1551 }
 0x49a   : > { %v1179_v54 = vmax.f32 %v1177_v15, %v1178_v57  ;;  %v1561_v41 = vsel %vm1113_vm12, %v1552_v22, -1e+30 }
 0x49b   : > { %v1315_v11 = vrot.slane %v1314_v20, 1  ;;  %v1443_v47 = vmax.f32 %v1441_v4, %v1442_v44  ;;  %v1572_v6 = vsel %vm1162_vm5, %v1561_v41, -inf }
 0x49c   : > { %v1180_v28 = vrot.slane %v1179_v54, 2  ;;  %v1573_v27 = vmax.f32 %v1565_v45, %v1572_v6 }
 0x49d   : > { %v3986_v48 = vmax.f32 %v1314_v20, %v1315_v11  ;;  %v1444_v50 = vrot.slane %v1443_v47, 4 }
 0x49e   : > { %v1181_v14 = vmax.f32 %v1179_v54, %v1180_v28  ;;  %v1575_v49 = vmax.f32 %v1571_v1, %v1573_v27 }
 0x49f   : > { %v1445_v55 = vmax.f32 %v1443_v47, %v1444_v50  ;;  %v1324_v38 = vmul.f32 %v3986_v48, %v3628_v36  ;;  %v1323_v23 = vmul.f32 %v3986_v48, %v3639_v37  ;;  %v1322_v45 = vmul.f32 %v3986_v48, %v3607_v33 }
 0x4a0   : > { %v1182_v30 = vrot.slane %v1181_v14, 1  ;;  %v1576_v7 = vmax.f32 %v1574_v39, %v1575_v49  ;;  %v1321_v41 = vmul.f32 %v3986_v48, %v3619_v35  ;;  %v1320_v47 = vmul.f32 %v3986_v48, %v3601_v32 }
 0x4a1   : > { %v1446_v8 = vrot.slane %v1445_v55, 2  ;;  %1347 = vrot.lane.b32.xlu1 %v1324_v38, %s3402_s25  ;;  %v1319_v1 = vmul.f32 %v3986_v48, %v3610_v34  ;;  %v1318_v50 = vmul.f32 %v3986_v48, %v3569_v21  ;;  %v1317_v49 = vmul.f32 %v3986_v48, %v3590_v26 }
 0x4a2   : > { %v1183_v59 = vmax.f32 %v1181_v14, %v1182_v30  ;;  %v1577_v16 = vrot.slane %v1576_v7, 4 }
 0x4a3   : > { %v1447_v15 = vmax.f32 %v1445_v55, %v1446_v8 }
 0x4a4   : > { %v1578_v19 = vmax.f32 %v1576_v7, %v1577_v16  ;;  %v1191_v51 = vmul.f32 %v1183_v59, %v3628_v36  ;;  %v1190_v53 = vmul.f32 %v1183_v59, %v3639_v37  ;;  %v1189_v22 = vmul.f32 %v1183_v59, %v3607_v33 }
 0x4a5   : > { %v1448_v42 = vrot.slane %v1447_v15, 1  ;;  %v1188_v54 = vmul.f32 %v1183_v59, %v3619_v35  ;;  %v1187_v11 = vmul.f32 %v1183_v59, %v3601_v32  ;;  %v1186_v31 = vmul.f32 %v1183_v59, %v3610_v34 }
 0x4a6   : > { %v1579_v52 = vrot.slane %v1578_v19, 2  ;;  %1214 = vrot.lane.b32.xlu0 %v1191_v51, %s3402_s25  ;;  %1212 = vrot.lane.b32.xlu1 %v1190_v53, %s3402_s25  ;;  %v1185_v27 = vmul.f32 %v1183_v59, %v3569_v21  ;;  %v1184_v14 = vmul.f32 %v1183_v59, %v3590_v26 }
 0x4a7   : > { %v1449_v13 = vmax.f32 %v1447_v15, %v1448_v42 }
 0x4a8   : > { %v1580_v10 = vmax.f32 %v1578_v19, %v1579_v52 }
 0x4a9   : > { %v1457_v2 = vmul.f32 %v1449_v13, %v3628_v36  ;;  %v1456_v44 = vmul.f32 %v1449_v13, %v3639_v37 }
 0x4aa   : > { %v1581_v57 = vrot.slane %v1580_v10, 1 }
 0x4ab   : > { %1480 = vrot.lane.b32.xlu0 %v1457_v2, %s3402_s25 }
 0x4ac   : > { %v1582_v4 = vmax.f32 %v1580_v10, %v1581_v57 }
 0x4ae   : > { %v1590_v20 = vmul.f32 %v1582_v4, %v3628_v36  ;;  %v1589_v46 = vmul.f32 %v1582_v4, %v3639_v37  ;;  %v1455_v36 = vmul.f32 %v1449_v13, %v3607_v33  ;;  %v1588_v3 = vmul.f32 %v1582_v4, %v3607_v33 }
 0x4af   : > { %1345 = vrot.lane.b32.xlu0 %v1323_v23, %s3402_s25  ;;  %v1454_v37 = vmul.f32 %v1449_v13, %v3619_v35  ;;  %v1587_v6 = vmul.f32 %v1582_v4, %v3619_v35  ;;  %v1453_v33 = vmul.f32 %v1449_v13, %v3601_v32  ;;  %v1586_v28 = vmul.f32 %v1582_v4, %v3601_v32 }
 0x4b0   : > { %1613 = vrot.lane.b32.xlu1 %v1590_v20, %s3402_s25  ;;  %v1452_v35 = vmul.f32 %v1449_v13, %v3610_v34  ;;  %v1585_v39 = vmul.f32 %v1582_v4, %v3610_v34  ;;  %v1451_v32 = vmul.f32 %v1449_v13, %v3569_v21  ;;  %v1584_v55 = vmul.f32 %v1582_v4, %v3569_v21 }
 0x4b1   : > { %v1450_v34 = vmul.f32 %v1449_v13, %v3590_v26  ;;  %v1583_v38 = vmul.f32 %v1582_v4, %v3590_v26 }
 0x4b3   : > { %1478 = vrot.lane.b32.xlu0 %v1456_v44, %s3402_s25 }
 0x4b4   : > { %1210 = vrot.lane.b32.xlu1 %v1189_v22, %s3402_s25 }
 0x4b7   : > { %1343 = vrot.lane.b32.xlu0 %v1322_v45, %s3402_s25 }
 0x4b8   : > { %1611 = vrot.lane.b32.xlu1 %v1589_v46, %s3402_s25 }
 0x4bb   : > { %1476 = vrot.lane.b32.xlu0 %v1455_v36, %s3402_s25 }
 0x4bc   : > { %1208 = vrot.lane.b32.xlu1 %v1188_v54, %s3402_s25 }
 0x4bf   : > { %1341 = vrot.lane.b32.xlu0 %v1321_v41, %s3402_s25 }
 0x4c0   : > { %1609 = vrot.lane.b32.xlu1 %v1588_v3, %s3402_s25 }
 0x4c3   : > { %1474 = vrot.lane.b32.xlu0 %v1454_v37, %s3402_s25 }
 0x4c4   : > { %1206 = vrot.lane.b32.xlu1 %v1187_v11, %s3402_s25 }
 0x4c7   : > { %1339 = vrot.lane.b32.xlu0 %v1320_v47, %s3402_s25 }
 0x4c8   : > { %1607 = vrot.lane.b32.xlu1 %v1587_v6, %s3402_s25 }
 0x4cb   : > { %1472 = vrot.lane.b32.xlu0 %v1453_v33, %s3402_s25 }
 0x4cc   : > { %1204 = vrot.lane.b32.xlu1 %v1186_v31, %s3402_s25 }
 0x4cf   : > { %1337 = vrot.lane.b32.xlu0 %v1319_v1, %s3402_s25 }
 0x4d0   : > { %1605 = vrot.lane.b32.xlu1 %v1586_v28, %s3402_s25 }
 0x4d3   : > { %1470 = vrot.lane.b32.xlu0 %v1452_v35, %s3402_s25 }
 0x4d4   : > { %1202 = vrot.lane.b32.xlu1 %v1185_v27, %s3402_s25 }
 0x4d7   : > { %1335 = vrot.lane.b32.xlu0 %v1318_v50, %s3402_s25 }
 0x4d8   : > { %1603 = vrot.lane.b32.xlu1 %v1585_v39, %s3402_s25 }
 0x4db   : > { %1468 = vrot.lane.b32.xlu0 %v1451_v32, %s3402_s25 }
 0x4dc   : > { %1200 = vrot.lane.b32.xlu1 %v1184_v14, %s3402_s25 }
 0x4df   : > { %1333 = vrot.lane.b32.xlu0 %v1317_v49, %s3402_s25 }
 0x4e0   : > { %1601 = vrot.lane.b32.xlu1 %v1584_v55, %s3402_s25 }
 0x4e3   : > { %1466 = vrot.lane.b32.xlu0 %v1450_v34, %s3402_s25 }
 0x4e4   : > { %1599 = vrot.lane.b32.xlu1 %v1583_v38, %s3402_s25 }
 0x513   : > { %v1348_v30 = vpop.permute.xlu1 %1347 }
 0x514   : > { %v1378_v7 = vsel %vm529_vm3, %v1348_v30, 0.0 }
 0x515   : > { %1379 = vadd.xlane.f32.xlu1 %v1378_v7 }
 0x518   : > { %v1215_v8 = vpop.permute.xlu0 %1214  ;;  %v1213_v59 = vpop.permute.xlu1 %1212 }
 0x519   : > { %v1245_v48 = vsel %vm529_vm3, %v1215_v8, 0.0  ;;  %v1242_v51 = vsel %vm529_vm3, %v1213_v59, 0.0 }
 0x51a   : > { %1246 = vadd.xlane.f32.xlu0 %v1245_v48 }
 0x51d   : > { %v1481_v21 = vpop.permute.xlu0 %1480 }
 0x51e   : > { %v1511_v16 = vsel %vm529_vm3, %v1481_v21, 0.0 }
 0x51f   : > { %1512 = vadd.xlane.f32.xlu0 %v1511_v16 }
 0x521   : > { %v1346_v15 = vpop.permute.xlu0 %1345 }
 0x522   : > { %v1614_v19 = vpop.permute.xlu1 %1613  ;;  %v1375_v26 = vsel %vm529_vm3, %v1346_v15, 0.0 }
 0x523   : > { %1376 = vadd.xlane.f32.xlu1 %v1375_v26  ;;  %1243 = vadd.xlane.f32.xlu0 %v1242_v51  ;;  %v1644_v13 = vsel %vm529_vm3, %v1614_v19, 0.0 }
 0x525   : > { %v1479_v53 = vpop.permute.xlu0 %1478 }
 0x526   : > { %v1211_v42 = vpop.permute.xlu1 %1210  ;;  %v1508_v52 = vsel %vm529_vm3, %v1479_v53, 0.0 }
 0x527   : > { %1509 = vadd.xlane.f32.xlu1 %v1508_v52  ;;  %1645 = vadd.xlane.f32.xlu0 %v1644_v13  ;;  %v1239_v4 = vsel %vm529_vm3, %v1211_v42, 0.0 }
 0x529   : > { %v1344_v10 = vpop.permute.xlu0 %1343 }
 0x52a   : > { %v1612_v2 = vpop.permute.xlu1 %1611  ;;  %v1372_v57 = vsel %vm529_vm3, %v1344_v10, 0.0 }
 0x52b   : > { %1373 = vadd.xlane.f32.xlu1 %v1372_v57  ;;  %1240 = vadd.xlane.f32.xlu0 %v1239_v4  ;;  %v1641_v22 = vsel %vm529_vm3, %v1612_v2, 0.0  ;;  %v4093_v57 = vld [vmem:[%s3522_s7 + $0x8] sm:$0xff] }
 0x52c   : > { %v4097_v4 = vld [vmem:[%s3522_s7 + $0x28] sm:$0xff] }
 0x52d   : > { %v1477_v23 = vpop.permute.xlu0 %1476 }
 0x52e   : > { %v1209_v20 = vpop.permute.xlu1 %1208  ;;  %v1505_v44 = vsel %vm529_vm3, %v1477_v23, 0.0  ;;  %v4101_v23 = vld [vmem:[%s3522_s7 + $0x38] sm:$0xff] }
 0x52f   : > { %1506 = vadd.xlane.f32.xlu1 %v1505_v44  ;;  %1642 = vadd.xlane.f32.xlu0 %v1641_v22  ;;  %v1236_v54 = vsel %vm529_vm3, %v1209_v20, 0.0  ;;  %v4104_v20 = vld [vmem:[%s3522_s7 + $0x18] sm:$0xff] }
 0x531   : > { %v1342_v45 = vpop.permute.xlu0 %1341 }
 0x532   : > { %v1610_v46 = vpop.permute.xlu1 %1609  ;;  %v1369_v36 = vsel %vm529_vm3, %v1342_v45, 0.0 }
 0x533   : > { %1370 = vadd.xlane.f32.xlu1 %v1369_v36  ;;  %1237 = vadd.xlane.f32.xlu0 %v1236_v54  ;;  %v1638_v11 = vsel %vm529_vm3, %v1610_v46, 0.0 }
 0x535   : > { %v1475_v41 = vpop.permute.xlu0 %1474 }
 0x536   : > { %v1207_v3 = vpop.permute.xlu1 %1206  ;;  %v1502_v37 = vsel %vm529_vm3, %v1475_v41, 0.0 }
 0x537   : > { %1503 = vadd.xlane.f32.xlu1 %v1502_v37  ;;  %1639 = vadd.xlane.f32.xlu0 %v1638_v11  ;;  %v1233_v31 = vsel %vm529_vm3, %v1207_v3, 0.0 }
 0x539   : > { %v1340_v47 = vpop.permute.xlu0 %1339 }
 0x53a   : > { %v1366_v6 = vsel %vm529_vm3, %v1340_v47, 0.0  ;;  %v1608_v33 = vpop.permute.xlu1 %1607 }
 0x53b   : > { %1367 = vadd.xlane.f32.xlu1 %v1366_v6  ;;  %1234 = vadd.xlane.f32.xlu0 %v1233_v31  ;;  %v1635_v27 = vsel %vm529_vm3, %v1608_v33, 0.0 }
 0x53d   : > { %v1473_v1 = vpop.permute.xlu0 %1472 }
 0x53e   : > { %v1499_v28 = vsel %vm529_vm3, %v1473_v1, 0.0  ;;  %v1205_v35 = vpop.permute.xlu1 %1204 }
 0x53f   : > { %1500 = vadd.xlane.f32.xlu1 %v1499_v28  ;;  %1636 = vadd.xlane.f32.xlu0 %v1635_v27  ;;  %v1230_v14 = vsel %vm529_vm3, %v1205_v35, 0.0 }
 0x541   : > { %v1338_v50 = vpop.permute.xlu0 %1337 }
 0x542   : > { %v1363_v39 = vsel %vm529_vm3, %v1338_v50, 0.0  ;;  %v1606_v32 = vpop.permute.xlu1 %1605 }
 0x543   : > { %1364 = vadd.xlane.f32.xlu1 %v1363_v39  ;;  %1231 = vadd.xlane.f32.xlu0 %v1230_v14  ;;  %v1632_v55 = vsel %vm529_vm3, %v1606_v32, 0.0 }
 0x545   : > { %v1471_v49 = vpop.permute.xlu0 %1470 }
 0x546   : > { %v1496_v34 = vsel %vm529_vm3, %v1471_v49, 0.0  ;;  %v1203_v38 = vpop.permute.xlu1 %1202 }
 0x547   : > { %1497 = vadd.xlane.f32.xlu1 %v1496_v34  ;;  %1633 = vadd.xlane.f32.xlu0 %v1632_v55  ;;  %v1227_v7 = vsel %vm529_vm3, %v1203_v38, 0.0 }
 0x549   : > { %v1336_v30 = vpop.permute.xlu0 %1335 }
 0x54a   : > { %v1360_v8 = vsel %vm529_vm3, %v1336_v30, 0.0  ;;  %v1604_v48 = vpop.permute.xlu1 %1603 }
 0x54b   : > { %1361 = vadd.xlane.f32.xlu1 %v1360_v8  ;;  %1228 = vadd.xlane.f32.xlu0 %v1227_v7  ;;  %v1629_v59 = vsel %vm529_vm3, %v1604_v48, 0.0 }
 0x54d   : > { %v1469_v21 = vpop.permute.xlu0 %1468 }
 0x54e   : > { %v1493_v16 = vsel %vm529_vm3, %v1469_v21, 0.0  ;;  %v1201_v15 = vpop.permute.xlu1 %1200 }
 0x54f   : > { %1494 = vadd.xlane.f32.xlu1 %v1493_v16  ;;  %1630 = vadd.xlane.f32.xlu0 %v1629_v59  ;;  %v1224_v26 = vsel %vm529_vm3, %v1201_v15, 0.0 }
 0x551   : > { %v1334_v19 = vpop.permute.xlu0 %1333 }
 0x552   : > { %v1357_v51 = vsel %vm529_vm3, %v1334_v19, 0.0  ;;  %v1602_v53 = vpop.permute.xlu1 %1601 }
 0x553   : > { %1358 = vadd.xlane.f32.xlu1 %v1357_v51  ;;  %1225 = vadd.xlane.f32.xlu0 %v1224_v26  ;;  %v1626_v52 = vsel %vm529_vm3, %v1602_v53, 0.0 }
 0x555   : > { %v1467_v42 = vpop.permute.xlu0 %1466 }
 0x556   : > { %v1490_v13 = vsel %vm529_vm3, %v1467_v42, 0.0  ;;  %v1600_v10 = vpop.permute.xlu1 %1599 }
 0x557   : > { %1491 = vadd.xlane.f32.xlu1 %v1490_v13  ;;  %1627 = vadd.xlane.f32.xlu0 %v1626_v52  ;;  %v1623_v2 = vsel %vm529_vm3, %v1600_v10, 0.0 }
 0x55b   : > { %1624 = vadd.xlane.f32.xlu0 %v1623_v2 }
 0x568   : > { %1702 = vrot.lane.b32.xlu1 %v4093_v57, %s3408_s14 }
 0x56c   : > { %1706 = vrot.lane.b32.xlu1 %v4097_v4, %s3408_s14 }
 0x570   : > { %1708 = vrot.lane.b32.xlu1 %v4101_v23, %s3408_s14 }
 0x571   : > { %1704 = vrot.lane.b32.xlu0 %v4104_v20, %s3408_s14 }
 0x59e   : > { %v1380_v22 = vpop.xlane.xlu1 %1379 }
 0x59f   : > { %v1388_v3 = vsub.f32 %v3826_v40, %v1380_v22 }
 0x5a3   : > { %v1247_v44 = vpop.xlane.xlu0 %1246 }
 0x5a4   : > { %v1255_v54 = vsub.f32 %v3826_v40, %v1247_v44 }
 0x5a6   : > { %v1663_v47 = vsel %vm1655_vm13, %v1255_v54, %v1388_v3 }
 0x5a8   : > { %v1513_v45 = vpop.xlane.xlu0 %1512 }
 0x5a9   : > { %v1521_v41 = vsub.f32 %v3826_v40, %v1513_v45 }
 0x5ab   : > { %v1672_v33 = vsel %vm1664_vm14, %v1663_v47, %v1521_v41 }
 0x5ac   : > { %v1244_v46 = vpop.xlane.xlu0 %1243  ;;  %v1377_v36 = vpop.xlane.xlu1 %1376 }
 0x5ad   : > { %v1254_v27 = vsub.f32 %v3836_v43, %v1244_v46  ;;  %v1387_v50 = vsub.f32 %v3836_v43, %v1377_v36 }
 0x5af   : > { %v1662_v49 = vsel %vm1655_vm13, %v1254_v27, %v1387_v50 }
 0x5b0   : > { %v1646_v37 = vpop.xlane.xlu0 %1645  ;;  %v1510_v11 = vpop.xlane.xlu1 %1509 }
 0x5b1   : > { %v1654_v6 = vsub.f32 %v3826_v40, %v1646_v37  ;;  %v1520_v39 = vsub.f32 %v3836_v43, %v1510_v11 }
 0x5b3   : > { %v1681_v31 = vsel %vm1673_vm15, %v1672_v33, %v1654_v6  ;;  %v1671_v55 = vsel %vm1664_vm14, %v1662_v49, %v1520_v39 }
 0x5b4   : > { %v1696_v1 = vmul.f32 1.442695, %v1681_v31  ;;  %v1241_v28 = vpop.xlane.xlu0 %1240  ;;  %v1374_v35 = vpop.xlane.xlu1 %1373 }
 0x5b5   : > { %v1253_v8 = vsub.f32 %v3806_v18, %v1241_v28  ;;  %v1386_v48 = vsub.f32 %v3806_v18, %v1374_v35 }
 0x5b6   : > { %3283 = vpow2.f32 %v1696_v1 }
 0x5b7   : > { %v1661_v15 = vsel %vm1655_vm13, %v1253_v8, %v1386_v48 }
 0x5b8   : > { %v1643_v32 = vpop.xlane.xlu0 %1642  ;;  %v1507_v14 = vpop.xlane.xlu1 %1506 }
 0x5b9   : > { %v1653_v40 = vsub.f32 %v3836_v43, %v1643_v32  ;;  %v1519_v21 = vsub.f32 %v3806_v18, %v1507_v14 }
 0x5bb   : > { %v1680_v34 = vsel %vm1673_vm15, %v1671_v55, %v1653_v40  ;;  %v1670_v19 = vsel %vm1664_vm14, %v1661_v15, %v1519_v21 }
 0x5bc   : > { %v1694_v38 = vmul.f32 1.442695, %v1680_v34  ;;  %v1238_v30 = vpop.xlane.xlu0 %1237  ;;  %v1371_v7 = vpop.xlane.xlu1 %1370 }
 0x5bd   : > { %v1252_v13 = vsub.f32 %v3816_v29, %v1238_v30  ;;  %v1385_v10 = vsub.f32 %v3816_v29, %v1371_v7 }
 0x5be   : > { %3285 = vpow2.f32 %v1694_v38 }
 0x5bf   : > { %v1660_v22 = vsel %vm1655_vm13, %v1252_v13, %v1385_v10 }
 0x5c0   : > { %v1640_v59 = vpop.xlane.xlu0 %1639  ;;  %v1504_v16 = vpop.xlane.xlu1 %1503 }
 0x5c1   : > { %v1652_v43 = vsub.f32 %v3806_v18, %v1640_v59  ;;  %v1518_v18 = vsub.f32 %v3816_v29, %v1504_v16 }
 0x5c3   : > { %v4128_v26 = vpop.eup %3283  ;;  %v1679_v51 = vsel %vm1673_vm15, %v1670_v19, %v1652_v43  ;;  %v1669_v46 = vsel %vm1664_vm14, %v1660_v22, %v1518_v18 }
 0x5c4   : > { %v1692_v53 = vmul.f32 1.442695, %v1679_v51  ;;  %v1235_v42 = vpop.xlane.xlu0 %1234  ;;  %3085 = vmatprep.subr.mxu1 %v4128_v26  ;;  %v1368_v52 = vpop.xlane.xlu1 %1367 }
 0x5c5   : > { %3086 = vmatpush3.msra.mxu1 %v4128_v26  ;;  %v1251_v11 = vsub.f32 %v3794_v12, %v1235_v42  ;;  %v1384_v47 = vsub.f32 %v3794_v12, %v1368_v52 }
 0x5c6   : > { %3287 = vpow2.f32 %v1692_v53 }
 0x5c7   : > { %v1659_v31 = vsel %vm1655_vm13, %v1251_v11, %v1384_v47 }
 0x5c8   : > { %v1637_v2 = vpop.xlane.xlu0 %1636  ;;  %v1501_v44 = vpop.xlane.xlu1 %1500 }
 0x5c9   : > { %v1651_v45 = vsub.f32 %v3816_v29, %v1637_v2  ;;  %v1517_v29 = vsub.f32 %v3794_v12, %v1501_v44 }
 0x5cb   : > { %v4139_v36 = vpop.eup %3285  ;;  %v1678_v54 = vsel %vm1673_vm15, %v1669_v46, %v1651_v45  ;;  %v1668_v28 = vsel %vm1664_vm14, %v1659_v31, %v1517_v29 }
 0x5cc   : > { %v1690_v41 = vmul.f32 1.442695, %v1678_v54  ;;  %v1232_v3 = vpop.xlane.xlu0 %1231  ;;  %3087 = vmatprep.subr.mxu1 %v4139_v36  ;;  %v1365_v37 = vpop.xlane.xlu1 %1364 }
 0x5cd   : > { %3088 = vmatpush3.msra.mxu1 %v4139_v36  ;;  %v1250_v14 = vsub.f32 %v3804_v17, %v1232_v3  ;;  %v1383_v49 = vsub.f32 %v3804_v17, %v1365_v37 }
 0x5ce   : > { %3289 = vpow2.f32 %v1690_v41 }
 0x5cf   : > { %v1658_v34 = vsel %vm1655_vm13, %v1250_v14, %v1383_v49 }
 0x5d0   : > { %v1634_v6 = vpop.xlane.xlu0 %1633  ;;  %v1498_v33 = vpop.xlane.xlu1 %1497 }
 0x5d1   : > { %v1650_v1 = vsub.f32 %v3794_v12, %v1634_v6  ;;  %v1516_v12 = vsub.f32 %v3804_v17, %v1498_v33 }
 0x5d3   : > { %v4150_v35 = vpop.eup %3287  ;;  %v1677_v27 = vsel %vm1673_vm15, %v1668_v28, %v1650_v1  ;;  %v1667_v30 = vsel %vm1664_vm14, %v1658_v34, %v1516_v12 }
 0x5d4   : > { %v1688_v50 = vmul.f32 1.442695, %v1677_v27  ;;  %v1229_v39 = vpop.xlane.xlu0 %1228  ;;  %3089 = vmatprep.subr.mxu1 %v4150_v35  ;;  %v1362_v32 = vpop.xlane.xlu1 %1361 }
 0x5d5   : > { %3090 = vmatpush3.msra.mxu1 %v4150_v35  ;;  %v1249_v16 = vsub.f32 %v3776_v5, %v1229_v39  ;;  %v1382_v15 = vsub.f32 %v3776_v5, %v1362_v32 }
 0x5d6   : > { %3291 = vpow2.f32 %v1688_v50 }
 0x5d7   : > { %v1657_v51 = vsel %vm1655_vm13, %v1249_v16, %v1382_v15 }
 0x5d8   : > { %v1631_v40 = vpop.xlane.xlu0 %1630  ;;  %v1495_v55 = vpop.xlane.xlu1 %1494 }
 0x5d9   : > { %v1649_v38 = vsub.f32 %v3804_v17, %v1631_v40  ;;  %v1515_v17 = vsub.f32 %v3776_v5, %v1495_v55 }
 0x5db   : > { %v4161_v7 = vpop.eup %3289  ;;  %v1676_v8 = vsel %vm1673_vm15, %v1667_v30, %v1649_v38  ;;  %v1666_v13 = vsel %vm1664_vm14, %v1657_v51, %v1515_v17 }
 0x5dc   : > { %v1686_v48 = vmul.f32 1.442695, %v1676_v8  ;;  %v1226_v21 = vpop.xlane.xlu0 %1225  ;;  %3091 = vmatprep.subr.mxu1 %v4161_v7  ;;  %v1359_v59 = vpop.xlane.xlu1 %1358 }
 0x5dd   : > { %3092 = vmatpush3.msra.mxu1 %v4161_v7  ;;  %v1248_v53 = vsub.f32 %v3784_v9, %v1226_v21  ;;  %v1381_v42 = vsub.f32 %v3784_v9, %v1359_v59 }
 0x5de   : > { %3293 = vpow2.f32 %v1686_v48 }
 0x5df   : > { %v1656_v46 = vsel %vm1655_vm13, %v1248_v53, %v1381_v42 }
 0x5e0   : > { %v1628_v43 = vpop.xlane.xlu0 %1627  ;;  %v1492_v19 = vpop.xlane.xlu1 %1491 }
 0x5e1   : > { %v1648_v52 = vsub.f32 %v3776_v5, %v1628_v43  ;;  %v1514_v10 = vsub.f32 %v3784_v9, %v1492_v19 }
 0x5e3   : > { %v4175_v18 = vpop.eup %3291  ;;  %v1675_v2 = vsel %vm1673_vm15, %v1666_v13, %v1648_v52  ;;  %v1665_v5 = vsel %vm1664_vm14, %v1656_v46, %v1514_v10 }
 0x5e4   : > { %v1684_v44 = vmul.f32 1.442695, %v1675_v2  ;;  %v1625_v22 = vpop.xlane.xlu0 %1624  ;;  %3093 = vmatprep.subr.mxu1 %v4175_v18  ;;  %v4179_v45 = vpop.permute.xlu1 %1702 }
 0x5e5   : > { %v1647_v54 = vsub.f32 %v3784_v9, %v1625_v22  ;;  %3094 = vmatpush3.msra.mxu1 %v4175_v18  ;;  %3101 = vmatprep.mubr.msk.f32.mxu1 %vm391_vm2, %v4179_v45 }
 0x5e6   : > { %3295 = vpow2.f32 %v1684_v44 }
 0x5e7   : > { %v1674_v41 = vsel %vm1673_vm15, %v1665_v5, %v1647_v54  ;;  %v4458_v54 = vld [vmem:[#allocation12_spill] sm:$0xff] }
 0x5e8   : > { %v1682_v3 = vmul.f32 1.442695, %v1674_v41  ;;  %v4196_v9 = vpop.permute.xlu1 %1706  ;;  %v4198_v29 = vpop.permute.xlu0 %1704 }
 0x5ea   : > { %3297 = vpow2.f32 %v1682_v3 }
 0x5eb   : > { %v4188_v37 = vpop.eup %3293 }
 0x5ec   : > { %3095 = vmatprep.subr.mxu1 %v4188_v37  ;;  %v4204_v6 = vpop.permute.xlu1 %1708 }
 0x5ed   : > { %3096 = vmatpush3.msra.mxu1 %v4188_v37 }
 0x5f3   : > { %v4192_v11 = vpop.eup %3295 }
 0x5f4   : > { %3097 = vmatprep.subr.mxu1 %v4192_v11 }
 0x5f5   : > { %3098 = vmatpush3.msra.mxu1 %v4192_v11 }
 0x5f7   : > { %v3298_v47 = vpop.eup %3297 }
 0x5f8   : > { %3099 = vmatprep.subr.mxu1 %v3298_v47 }
 0x5f9   : > { %3100 = vmatpush3.msra.mxu1 %v3298_v47 }
 0x5fa   : > { %3102 = vmatmul.mubr.msk.f32.vlgmr.msra.gmra.mxu1 %vm391_vm2, %v4198_v29 }
 0x5fb   : > { %3104 = vmatprep.mubr.msk.f32.mxu1 %vm391_vm2, %v4196_v9 }
 0x5fe   : > { %3105 = vmatmul.mubr.msk.f32.gmra.mxu1 %vm391_vm2, %v4204_v6 }
 0x6ba   : > { %v3103_v33 = vpop.f32.mrf.mxu1 }
 0x6bc   : > { %v1784_v31 = vpop.f32.mrf.mxu1 }
 0x6be   : > { %v3106_v1 = vpop.f32.mrf.mxu1 }
 0x6bf   : > { %3107 = vmatprep.subr.mxu0 %v3106_v1 }
 0x6c0   : > { %v1794_v28 = vpop.f32.mrf.mxu1  ;;  %3108 = vmatpush3.msra.mxu0 %v3106_v1 }
 0x6c1   : > { %3109 = vmatprep.subr.mxu0 %v1794_v28 }
 0x6c2   : > { %3110 = vmatpush3.msra.mxu0 %v1794_v28  ;;  %v4461_v28 = vld [vmem:[#allocation10_spill] sm:$0xff] }
 0x6c3   : > { %3111 = vmatprep.subr.mxu0 %v3103_v33 }
 0x6c4   : > { %3112 = vmatpush3.msra.mxu0 %v3103_v33  ;;  %v4460_v33 = vld [vmem:[#allocation8_spill] sm:$0xff] }
 0x6c5   : > { %3113 = vmatprep.subr.mxu0 %v1784_v31 }
 0x6c6   : > { %3114 = vmatpush3.msra.mxu0 %v1784_v31 }
 0x6c7   : > { %3116 = vmatmul.mubr.msk.f32.vlgmr.msra.gmra.mxu0 %vm529_vm3, %v3692_v56  ;;  %v271_v56 = vld [vmem:[%s4433_s4 + $0x20] sm:$0xf] }
 0x6c8   : > { %3118 = vmatprep.mubr.msk.f32.mxu0 %vm529_vm3, %v3702_v60  ;;  %3127 = vmatprep.subr.msk.mxu1 %vm1949_vm0, %v271_v56 }
 0x6c9   : > { %3128 = vmatpush3.msk.msra.mxu1 %vm1949_vm0, %v271_v56 }
 0x6cb   : > { %3119 = vmatmul.mubr.msk.f32.gmra.mxu0 %vm529_vm3, %v3694_v58 }
 0x6cc   : > { %3121 = vmatprep.mubr.msk.f32.mxu0 %vm529_vm3, %v3710_v62 }
 0x6cf   : > { %3122 = vmatmul.mubr.msk.f32.gmra.mxu0 %vm529_vm3, %v3706_v61 }
 0x6d0   : > { %3124 = vmatprep.mubr.msk.f32.mxu0 %vm529_vm3, %v3718_v0 }
 0x6d3   : > { %3125 = vmatmul.mubr.msk.f32.gmra.mxu0 %vm529_vm3, %v3716_v63 }
 0x787   : > { %v3117_v58 = vpop.f32.mrf.mxu0 }
 0x788   : > { %v1875_v60 = vadd.f32 1e-16, %v3117_v58 }
 0x789   : > { %v1869_v27 = vpop.f32.mrf.mxu0 }
 0x78a   : > { %v1870_v62 = vadd.f32 1e-16, %v1869_v27  ;;  %3299 = vrcp.f32 %v1875_v60  ;;  %v4462_v60 = vld [vmem:[#allocation6_spill] sm:$0xff] }
 0x78b   : > { %v3120_v50 = vpop.f32.mrf.mxu0 }
 0x78c   : > { %3301 = vrcp.f32 %v1870_v62  ;;  %v1885_v61 = vadd.f32 1e-16, %v3120_v50  ;;  %v4463_v62 = vld [vmem:[#allocation9_spill] sm:$0xff] }
 0x78d   : > { %v1879_v39 = vpop.f32.mrf.mxu0 }
 0x78e   : > { %v1880_v0 = vadd.f32 1e-16, %v1879_v39  ;;  %3303 = vrcp.f32 %v1885_v61  ;;  %v4274_v61 = vld [vmem:[%s3522_s7 + $0x10] sm:$0xff] }
 0x78f   : > { %v3123_v32 = vpop.f32.mrf.mxu0 }
 0x790   : > { %3305 = vrcp.f32 %v1880_v0  ;;  %v1895_v63 = vadd.f32 1e-16, %v3123_v32  ;;  %v4464_v0 = vld [vmem:[#allocation11_spill] sm:$0xff] }
 0x791   : > { %v1889_v14 = vpop.f32.mrf.mxu0 }
 0x792   : > { %v1890_v49 = vadd.f32 1e-16, %v1889_v14  ;;  %3307 = vrcp.f32 %v1895_v63  ;;  %v4281_v63 = vld [vmem:[%s3522_s7 + $0x20] sm:$0xff] }
 0x793   : > { %v3126_v12 = vpop.f32.mrf.mxu0  ;;  %v4465_v14 = vld [vmem:[#allocation13_spill] sm:$0xff] }
 0x794   : > { %3309 = vrcp.f32 %v1890_v49  ;;  %v1905_v40 = vadd.f32 1e-16, %v3126_v12  ;;  %v4288_v12 = vld [vmem:[%s3522_s7 + $0x30] sm:$0xff] }
 0x795   : > { %v1899_v55 = vpop.f32.mrf.mxu0 }
 0x796   : > { %v1900_v34 = vadd.f32 1e-16, %v1899_v55  ;;  %3311 = vrcp.f32 %v1905_v40  ;;  %v4466_v55 = vld [vmem:[#allocation7_spill] sm:$0xff] }
 0x797   : > { %v3300_v38 = vpop.eup %3299 }
 0x798   : > { %3313 = vrcp.f32 %v1900_v34  ;;  %v1917_v48 = vmul.f32 %v3300_v38, %v4192_v11 }
 0x799   : > { %v3302_v30 = vpop.eup %3301 }
 0x79a   : > { %v1916_v8 = vmul.f32 %v3302_v30, %v3298_v47 }
 0x79b   : > { %v3304_v21 = vpop.eup %3303 }
 0x79c   : > { %3129 = vmatprep.mubr.msk.f32.mxu1 %vm1924_vm1, %v1916_v8  ;;  %v1919_v15 = vmul.f32 %v3304_v21, %v4175_v18 }
 0x79d   : > { %v3306_v59 = vpop.eup %3305  ;;  %3130 = vmatmul.mubr.msk.f32.vlgmr.msra.gmra.mxu1 %vm1924_vm1, %v1917_v48 }
 0x79e   : > { %v1918_v16 = vmul.f32 %v3306_v59, %v4188_v37  ;;  %v4459_v37 = vld [vmem:[#allocation14_spill] sm:$0xff] }
 0x79f   : > { %v3308_v17 = vpop.eup %3307 }
 0x7a0   : > { %3132 = vmatprep.mubr.msk.f32.mxu1 %vm1924_vm1, %v1918_v16  ;;  %v1921_v51 = vmul.f32 %v3308_v17, %v4150_v35 }
 0x7a1   : > { %v3310_v43 = vpop.eup %3309  ;;  %3133 = vmatmul.mubr.msk.f32.gmra.mxu1 %vm1924_vm1, %v1919_v15 }
 0x7a2   : > { %v1920_v19 = vmul.f32 %v3310_v43, %v4161_v7 }
 0x7a3   : > { %v3312_v53 = vpop.eup %3311 }
 0x7a4   : > { %3135 = vmatprep.mubr.msk.f32.mxu1 %vm1924_vm1, %v1920_v19  ;;  %v1923_v13 = vmul.f32 %v3312_v53, %v4128_v26  ;;  %v4457_v26 = vld [vmem:[#allocation5_spill] sm:$0xff] }
 0x7a5   : > { %v3314_v42 = vpop.eup %3313  ;;  %3136 = vmatmul.mubr.msk.f32.gmra.mxu1 %vm1924_vm1, %v1921_v51 }
 0x7a6   : > { %v1922_v52 = vmul.f32 %v3314_v42, %v4139_v36 }
 0x7a8   : > { %3138 = vmatprep.mubr.msk.f32.mxu1 %vm1924_vm1, %v1922_v52  ;;  %v3336_v52 = vld [vmem:[%s4433_s4 + $0x10] sm:$0xff] }
 0x7a9   : > { %3139 = vmatmul.mubr.msk.f32.gmra.mxu1 %vm1924_vm1, %v1923_v13 }
 0x7aa   : > { %3171 = vmatprep.mubr.msk.f32.mxu1 %vm391_vm2, %v4179_v45 }
 0x85d   : > { %v3131_v7 = vpop.f32.mrf.mxu1 }
 0x85f   : > { %v2019_v10 = vpop.f32.mrf.mxu1 }
 0x861   : > { %v3134_v35 = vpop.f32.mrf.mxu1 }
 0x863   : > { %v2029_v18 = vpop.f32.mrf.mxu1 }
 0x865   : > { %v3137_v2 = vpop.f32.mrf.mxu1 }
 0x867   : > { %v2039_v44 = vpop.f32.mrf.mxu1 }
 0x869   : > { %v3140_v22 = vpop.f32.mrf.mxu1 }
 0x86a   : > { %2080 = vrot.lane.b32.xlu0 %v3140_v22, %s3403_s13 }
 0x86b   : > { %v2049_v46 = vpop.f32.mrf.mxu1 }
 0x86c   : > { %2078 = vrot.lane.b32.xlu1 %v2049_v46, %s3403_s13 }
 0x86e   : > { %2076 = vrot.lane.b32.xlu0 %v3137_v2, %s3403_s13 }
 0x870   : > { %2074 = vrot.lane.b32.xlu1 %v2039_v44, %s3403_s13 }
 0x872   : > { %2072 = vrot.lane.b32.xlu0 %v3134_v35, %s3403_s13 }
 0x874   : > { %2070 = vrot.lane.b32.xlu1 %v2029_v18, %s3403_s13  ;;  %v3410_v18 = vmov 98  }
 0x875   : > { %3280 = vset.pattern.permute.xlu1 %v3410_v18  ;;  %3279 = vset.pattern.permute.xlu0 %v3410_v18 }
 0x876   : > { %2068 = vrot.lane.b32.xlu0 %v3131_v7, %s3403_s13 }
 0x878   : > { %2066 = vrot.lane.b32.xlu1 %v2019_v10, %s3403_s13  ;;  %v3338_v10 = vld [vmem:[%s4433_s4] sm:$0xff] }
 0x87a   : > { %2125 = vrot.lane.b32.xlu0 %v3579_v24, %s3403_s13 }
 0x87e   : > { %2123 = vrot.lane.b32.xlu0 %v3583_v25, %s3403_s13  ;;  %v4262_v25 = vld [vmem:[%s3522_s7] sm:$0xff] }
 0x882   : > { %2121 = vrot.lane.b32.xlu0 %v4457_v26, %s3403_s13 }
 0x8dc   : > { %v2081_v36 = vpop.permute.xlu0 %2080 }
 0x8dd   : > { %v2097_v11 = vmul.f32 %v2081_v36, %v4459_v37 }
 0x8de   : > { %v2079_v41 = vpop.permute.xlu1 %2078 }
 0x8df   : > { %v2096_v49 = vmul.f32 %v2079_v41, %v4465_v14 }
 0x8e0   : > { %v2077_v45 = vpop.permute.xlu0 %2076 }
 0x8e1   : > { %v2095_v5 = vmul.f32 %v2077_v45, %v4458_v54 }
 0x8e2   : > { %v2075_v47 = vpop.permute.xlu1 %2074 }
 0x8e3   : > { %2242 = vrot.lane.b32.xlu0 %v2095_v5, %s3401_s23  ;;  %v2094_v32 = vmul.f32 %v2075_v47, %v4464_v0 }
 0x8e4   : > { %v2073_v3 = vpop.permute.xlu0 %2072 }
 0x8e5   : > { %v2093_v56 = vmul.f32 %v2073_v3, %v4461_v28 }
 0x8e6   : > { %v2071_v58 = vpop.permute.xlu1 %2070 }
 0x8e7   : > { %2246 = vrot.lane.b32.xlu0 %v2097_v11, %s3401_s23  ;;  %v2092_v50 = vmul.f32 %v2071_v58, %v4463_v62 }
 0x8e8   : > { %v2069_v24 = vpop.permute.xlu0 %2068 }
 0x8e9   : > { %v2091_v31 = vmul.f32 %v2069_v24, %v4460_v33 }
 0x8ea   : > { %v2067_v40 = vpop.permute.xlu1 %2066 }
 0x8eb   : > { %2098 = vrot.lane.b32.xlu0 %v4262_v25, %s3409_s17  ;;  %2234 = vrot.lane.b32.xlu1 %v2091_v31, %s3401_s23  ;;  %v2090_v34 = vmul.f32 %v2067_v40, %v4466_v55 }
 0x8ec   : > { %v2126_v1 = vpop.permute.xlu0 %2125 }
 0x8ed   : > { %3141 = vmatprep.subr.mxu0 %v2126_v1 }
 0x8ee   : > { %3142 = vmatpush3.msra.mxu0 %v2126_v1 }
 0x8ef   : > { %2119 = vrot.lane.b32.xlu0 %v4462_v60, %s3403_s13  ;;  %2238 = vrot.lane.b32.xlu1 %v2093_v56, %s3401_s23  ;;  %s234_s13 = sand.u32 1, %s3391_s19  }
 0x8f0   : > { %v2124_v27 = vpop.permute.xlu0 %2123  ;;  %s2738_s14 = sshll.u32 %s234_s13, 5  ;;  %s4389_s26 = scalar_lea.sflag [#allocation3], %s234_s13 }
 0x8f1   : > { %3143 = vmatprep.subr.mxu0 %v2124_v27  ;;  %s236_s15 = scalar_lea.vmem [#allocation2], %s2738_s14 }
 0x8f2   : > { %3144 = vmatpush3.msra.mxu0 %v2124_v27  ;;  %s2660_s16 = sshll.u32 %s236_s15, 4  ;;  %s4380_s16 = int_to_ptr.vmem [resolvable:$true] %s2660_s16 }
 0x8f3   : > { %2236 = vrot.lane.b32.xlu1 %v2092_v50, %s3401_s23  ;;  %2102 = vrot.lane.b32.xlu0 %v4274_v61, %s3409_s17  ;;  %s3339_s30 = scalar_lea.vmem %s4380_s16, 512 }
 0x8f4   : > { %v2122_v39 = vpop.permute.xlu0 %2121  ;;  %p3340_p12 = scmp.ne.s32.totalorder %s4380_s16, %s3339_s30 }
 0x8f5   : > { %3145 = vmatprep.subr.mxu0 %v2122_v39 }
 0x8f6   : > { %3146 = vmatpush3.msra.mxu0 %v2122_v39  ;;  %p3341_p13 = pnand %p3340_p12, %p3487_p5 }
 0x8f7   : > { %2240 = vrot.lane.b32.xlu1 %v2094_v32, %s3401_s23  ;;  %2106 = vrot.lane.b32.xlu0 %v4281_v63, %s3409_s17 }
 0x8f8   : > { %p3342_p0 = pneg %p3341_p13 }
 0x8fb   : > { %2244 = vrot.lane.b32.xlu1 %v2096_v49, %s3401_s23  ;;  %2110 = vrot.lane.b32.xlu0 %v4288_v12, %s3409_s17 }
 0x8ff   : > { %2100 = vrot.lane.b32.xlu1 %v4093_v57, %s3409_s17  ;;  %2547 = vperm.xlu0 %3279, %v4262_v25  }
 0x903   : > { %2232 = vrot.lane.b32.xlu1 %v2090_v34, %s3401_s23  ;;  %2559 = vperm.xlu0 %3279, %v4288_v12  }
 0x907   : > { %2104 = vrot.lane.b32.xlu1 %v4104_v20, %s3409_s17  ;;  %v3335_v20 = vld [vmem:[%s4433_s4 + $0x18] sm:$0xff] }
 0x90b   : > { %2108 = vrot.lane.b32.xlu1 %v4097_v4, %s3409_s17 }
 0x90f   : > { %2112 = vrot.lane.b32.xlu1 %v4101_v23, %s3409_s17  ;;  %s2824_s17 = sshll.u32 %s3470_s22, 9  ;;  %s3416_s22 = smov [#allocation2]  }
 0x910   : > { %s4386_s25 = scalar_lea.hbm %s4434_s5, %s2824_s17  ;;  %s3343_s6 = sshll.u32 %s3416_s22, 4  ;;  %s3344_s6 = int_to_ptr.vmem [resolvable:$false] %s3343_s6 }
 0x911   : > { %s3345_s8 = scalar_lea.vmem %s3344_s6, 1024  ;;  %p3346_p1 = scmp.lt.s32.totalorder %s4380_s16, %s3344_s6 }
 0x912   : > { %p3347_p2 = scmp.lt.s32.totalorder %s3345_s8, %s3339_s30 }
 0x913   : > { %2551 = vperm.xlu1 %3280, %v4274_v61  }
 0x914   : > { %p3348_p3 = por %p3347_p2, %p3346_p1 }
 0x916   : > { %p3349_p4 = pnand %p3348_p3, %p3342_p0 }
 0x917   : > { %2555 = vperm.xlu1 %3280, %v4281_v63  }
 0x955   : > { %v2243_v38 = vpop.permute.xlu0 %2242 }
 0x959   : > { %v2247_v30 = vpop.permute.xlu0 %2246 }
 0x95a   : > { %3155 = vmatprep.subr.mxu1 %v2247_v30 }
 0x95b   : > { %3156 = vmatpush3.msra.mxu1 %v2247_v30 }
 0x95d   : > { %v2099_v8 = vpop.permute.xlu0 %2098  ;;  %v2235_v48 = vpop.permute.xlu1 %2234 }
 0x961   : > { %v2120_v57 = vpop.permute.xlu0 %2119  ;;  %v2239_v21 = vpop.permute.xlu1 %2238 }
 0x962   : > { %3147 = vmatprep.subr.mxu0 %v2120_v57 }
 0x963   : > { %3148 = vmatpush3.msra.mxu0 %v2120_v57 }
 0x964   : > { %3177 = vmatprep.subr.mxu0 %v3335_v20 }
 0x965   : > { %v2237_v59 = vpop.permute.xlu1 %2236  ;;  %v2103_v17 = vpop.permute.xlu0 %2102 }
 0x969   : > { %v2241_v4 = vpop.permute.xlu1 %2240  ;;  %v2107_v51 = vpop.permute.xlu0 %2106 }
 0x96d   : > { %v2245_v16 = vpop.permute.xlu1 %2244  ;;  %v2111_v7 = vpop.permute.xlu0 %2110 }
 0x96e   : > { %3157 = vmatprep.subr.mxu1 %v2245_v16 }
 0x96f   : > { %3158 = vmatpush3.msra.mxu1 %v2245_v16 }
 0x970   : > { %3159 = vmatprep.subr.mxu1 %v2243_v38 }
 0x971   : > { %3160 = vmatpush3.msra.mxu1 %v2243_v38  ;;  %v2101_v23 = vpop.permute.xlu1 %2100 }
 0x972   : > { %v2115_v15 = vsel %vm2114_vm4, %v2099_v8, %v2101_v23  ;;  %3161 = vmatprep.subr.mxu1 %v2241_v4 }
 0x973   : > { %3162 = vmatpush3.msra.mxu1 %v2241_v4  ;;  %3149 = vmatprep.mubr.msk.f32.mxu0 %vm529_vm3, %v2115_v15 }
 0x974   : > { %3163 = vmatprep.subr.mxu1 %v2239_v21 }
 0x975   : > { %3164 = vmatpush3.msra.mxu1 %v2239_v21  ;;  %v2233_v43 = vpop.permute.xlu1 %2232 }
 0x976   : > { %3165 = vmatprep.subr.mxu1 %v2237_v59 }
 0x977   : > { %3166 = vmatpush3.msra.mxu1 %v2237_v59 }
 0x978   : > { %3167 = vmatprep.subr.mxu1 %v2235_v48 }
 0x979   : > { %3168 = vmatpush3.msra.mxu1 %v2235_v48  ;;  %v2105_v19 = vpop.permute.xlu1 %2104 }
 0x97a   : > { %v2116_v53 = vsel %vm2114_vm4, %v2103_v17, %v2105_v19  ;;  %3169 = vmatprep.subr.mxu1 %v2233_v43 }
 0x97b   : > { %3170 = vmatpush3.msra.mxu1 %v2233_v43  ;;  %3150 = vmatmul.mubr.msk.f32.vlgmr.msra.gmra.mxu0 %vm529_vm3, %v2116_v53 }
 0x97c   : > { %3172 = vmatmul.mubr.msk.f32.vlgmr.msra.gmra.mxu1 %vm391_vm2, %v4198_v29  ;;  %3178 = vmatpush3.msra.mxu0 %v3335_v20  ;;  %v3337_v29 = vld [vmem:[%s4433_s4 + $0x8] sm:$0xff] }
 0x97d   : > { %3174 = vmatprep.mubr.msk.f32.mxu1 %vm391_vm2, %v4196_v9  ;;  %v2109_v42 = vpop.permute.xlu1 %2108  ;;  %3179 = vmatprep.subr.mxu0 %v3336_v52 }
 0x97e   : > { %v2117_v13 = vsel %vm2114_vm4, %v2107_v51, %v2109_v42  ;;  %3180 = vmatpush3.msra.mxu0 %v3336_v52 }
 0x97f   : > { %3152 = vmatprep.mubr.msk.f32.mxu0 %vm529_vm3, %v2117_v13  ;;  %3181 = vmatprep.subr.mxu0 %v3337_v29 }
 0x980   : > { %3175 = vmatmul.mubr.msk.f32.gmra.mxu1 %vm391_vm2, %v4204_v6  ;;  %3182 = vmatpush3.msra.mxu0 %v3337_v29  ;;  %v3411_v6 = vmov 99  }
 0x981   : > { %v2113_v9 = vpop.permute.xlu1 %2112  ;;  %3183 = vmatprep.subr.mxu0 %v3338_v10  ;;  %3281 = vset.pattern.permute.xlu1 %v3411_v6 }
 0x982   : > { %v2118_v35 = vsel %vm2114_vm4, %v2111_v7, %v2113_v9  ;;  %3184 = vmatpush3.msra.mxu0 %v3338_v10  ;;  %3282 = vset.pattern.permute.xlu0 %v3411_v6 }
 0x983   : > { %3153 = vmatmul.mubr.msk.f32.gmra.mxu0 %vm529_vm3, %v2118_v35  ;;  %2587 = vperm.xlu1 %3281, %v4262_v25  }
 0x984   : > { %2591 = vperm.xlu0 %3282, %v4274_v61  }
 0x987   : > { %2595 = vperm.xlu1 %3281, %v4281_v63  }
 0x98b   : > { %2599 = vperm.xlu1 %3281, %v4288_v12  }
 0xa3b   : > { %v3151_v2 = vpop.f32.mrf.mxu0 }
 0xa3c   : > { %v3173_v44 = vpop.f32.mrf.mxu1 }
 0xa3d   : > { %v4336_v22 = vadd.f32 %v3173_v44, %v3151_v2  ;;  %v2205_v46 = vpop.f32.mrf.mxu0 }
 0xa3e   : > { %v2322_v26 = vpop.f32.mrf.mxu1 }
 0xa3f   : > { %v4339_v36 = vmul.f32 0.70710677, %v4336_v22  ;;  %v4341_v45 = vadd.f32 %v2322_v26, %v2205_v46 }
 0xa40   : > { %v3176_v41 = vpop.f32.mrf.mxu1 }
 0xa41   : > { %v2358_v54 = vand.u32 2147483647, %v4339_v36  ;;  %v4345_v5 = vmul.f32 0.70710677, %v4341_v45  ;;  %vm2350_vm2 = vcmp.ge.f32.partialorder %v4339_v36, 0.0 }
 0xa42   : > { %v2332_v31 = vpop.f32.mrf.mxu1 }
 0xa43   : > { %v2362_v3 = vmul.f32 0.3275911, %v2358_v54  ;;  %v2357_v37 = vand.u32 2147483647, %v4345_v5  ;;  %v3154_v11 = vpop.f32.mrf.mxu0  ;;  %v2414_v0 = vsub.f32 0.0, %v2358_v54  ;;  %vm2349_vm5 = vcmp.ge.f32.partialorder %v4345_v5, 0.0 }
 0xa44   : > { %v4348_v47 = vadd.f32 %v3176_v41, %v3154_v11 }
 0xa45   : > { %v2366_v24 = vadd.f32 1.0, %v2362_v3  ;;  %v2361_v33 = vmul.f32 0.3275911, %v2357_v37  ;;  %v2215_v1 = vpop.f32.mrf.mxu0  ;;  %v2413_v49 = vsub.f32 0.0, %v2357_v37  ;;  %v2418_v40 = vmul.f32 %v2414_v0, %v2358_v54 }
 0xa46   : > { %v4351_v28 = vmul.f32 0.70710677, %v4348_v47  ;;  %v4353_v56 = vadd.f32 %v2332_v31, %v2215_v1 }
 0xa47   : > { %3315 = vrcp.f32 %v2366_v24  ;;  %v2365_v58 = vadd.f32 1.0, %v2361_v33  ;;  %v2417_v34 = vmul.f32 %v2413_v49, %v2357_v37  ;;  %v2423_v8 = vmul.f32 1.442695, %v2418_v40 }
 0xa48   : > { %v2360_v60 = vand.u32 2147483647, %v4351_v28  ;;  %v4357_v27 = vmul.f32 0.70710677, %v4353_v56  ;;  %vm2352_vm6 = vcmp.ge.f32.partialorder %v4351_v28, 0.0 }
 0xa49   : > { %3317 = vrcp.f32 %v2365_v58  ;;  %v2421_v59 = vmul.f32 1.442695, %v2417_v34 }
 0xa4a   : > { %v2364_v62 = vmul.f32 0.3275911, %v2360_v60  ;;  %v2359_v50 = vand.u32 2147483647, %v4357_v27  ;;  %v2416_v38 = vsub.f32 0.0, %v2360_v60  ;;  %vm2351_vm7 = vcmp.ge.f32.partialorder %v4357_v27, 0.0  ;;  %v2552_v27 = vpop.permute.xlu1 %2551 }
 0xa4c   : > { %v2368_v39 = vadd.f32 1.0, %v2364_v62  ;;  %v2363_v32 = vmul.f32 0.3275911, %v2359_v50  ;;  %v2415_v21 = vsub.f32 0.0, %v2359_v50  ;;  %v2420_v4 = vmul.f32 %v2416_v38, %v2360_v60 }
 0xa4e   : > { %3319 = vrcp.f32 %v2368_v39  ;;  %v2367_v14 = vadd.f32 1.0, %v2363_v32  ;;  %v2419_v43 = vmul.f32 %v2415_v21, %v2359_v50  ;;  %v2427_v53 = vmul.f32 1.442695, %v2420_v4 }
 0xa4f   : > { %v3412_v32 = vmov -1.0  }
 0xa50   : > { %3321 = vrcp.f32 %v2367_v14  ;;  %v2425_v10 = vmul.f32 1.442695, %v2419_v43  ;;  %v2354_v14 = vsel %vm2350_vm2, 1.0, %v3412_v32  ;;  %v2356_v43 = vsel %vm2352_vm6, 1.0, %v3412_v32 }
 0xa51   : > { %3323 = vpow2.f32 %v2423_v8 }
 0xa52   : > { %3325 = vpow2.f32 %v2421_v59 }
 0xa53   : > { %3327 = vpow2.f32 %v2427_v53 }
 0xa54   : > { %v3316_v55 = vpop.eup %3315  ;;  %3329 = vpow2.f32 %v2425_v10  ;;  %v2548_v10 = vpop.permute.xlu0 %2547 }
 0xa55   : > { %v2378_v30 = vmul.f32 1.0614054, %v3316_v55 }
 0xa56   : > { %v3318_v48 = vpop.eup %3317 }
 0xa57   : > { %v2382_v57 = vadd.f32 -1.4531521, %v2378_v30  ;;  %v2377_v20 = vmul.f32 1.0614054, %v3318_v48 }
 0xa59   : > { %v2386_v16 = vmul.f32 %v3316_v55, %v2382_v57  ;;  %v2381_v23 = vadd.f32 -1.4531521, %v2377_v20  ;;  %v2353_v57 = vsel %vm2349_vm5, 1.0, %v3412_v32 }
 0xa5b   : > { %v3320_v15 = vpop.eup %3319  ;;  %v2390_v17 = vadd.f32 1.4214138, %v2386_v16  ;;  %v2385_v19 = vmul.f32 %v3318_v48, %v2381_v23  ;;  %v2341_v16 = vmul.f32 0.5, %v4341_v45  ;;  %v2343_v45 = vmul.f32 0.5, %v4353_v56 }
 0xa5c   : > { %v2380_v51 = vmul.f32 1.0614054, %v3320_v15 }
 0xa5d   : > { %v2394_v42 = vmul.f32 %v3316_v55, %v2390_v17  ;;  %v3322_v52 = vpop.eup %3321  ;;  %v2389_v13 = vadd.f32 1.4214138, %v2385_v19  ;;  %v2342_v17 = vmul.f32 0.5, %v4336_v22  ;;  %v2344_v22 = vmul.f32 0.5, %v4348_v47 }
 0xa5e   : > { %v2384_v7 = vadd.f32 -1.4531521, %v2380_v51  ;;  %v2379_v9 = vmul.f32 1.0614054, %v3322_v52  ;;  %v3324_v24 = vpop.eup %3323 }
 0xa5f   : > { %v2398_v29 = vadd.f32 -0.28449672, %v2394_v42  ;;  %v2393_v35 = vmul.f32 %v3318_v48, %v2389_v13  ;;  %v3326_v50 = vpop.eup %3325  ;;  %v2355_v13 = vsel %vm2351_vm7, 1.0, %v3412_v32 }
 0xa60   : > { %v2388_v18 = vmul.f32 %v3320_v15, %v2384_v7  ;;  %v2383_v2 = vadd.f32 -1.4531521, %v2379_v9  ;;  %v3328_v8 = vpop.eup %3327 }
 0xa61   : > { %v2402_v6 = vmul.f32 %v3316_v55, %v2398_v29  ;;  %v2397_v44 = vadd.f32 -0.28449672, %v2393_v35  ;;  %v3330_v4 = vpop.eup %3329  ;;  %v2556_v35 = vpop.permute.xlu1 %2555 }
 0xa62   : > { %v2392_v46 = vadd.f32 1.4214138, %v2388_v18  ;;  %v2387_v54 = vmul.f32 %v3322_v52, %v2383_v2  ;;  %v2560_v18 = vpop.permute.xlu0 %2559 }
 0xa63   : > { %v2406_v26 = vadd.f32 0.2548296, %v2402_v6  ;;  %v2401_v41 = vmul.f32 %v3318_v48, %v2397_v44 }
 0xa64   : > { %v2396_v3 = vmul.f32 %v3320_v15, %v2392_v46  ;;  %v2391_v11 = vadd.f32 1.4214138, %v2387_v54 }
 0xa65   : > { %v2410_v37 = vmul.f32 %v3316_v55, %v2406_v26  ;;  %v2405_v33 = vadd.f32 0.2548296, %v2401_v41  ;;  %v2588_v6 = vpop.permute.xlu1 %2587 }
 0xa66   : > { %v2400_v31 = vadd.f32 -0.28449672, %v2396_v3  ;;  %v2395_v58 = vmul.f32 %v3322_v52, %v2391_v11  ;;  %v2592_v46 = vpop.permute.xlu0 %2591 }
 0xa67   : > { %v2430_v1 = vmul.f32 %v3324_v24, %v2410_v37  ;;  %v2409_v60 = vmul.f32 %v3318_v48, %v2405_v33 }
 0xa68   : > { %v2404_v62 = vmul.f32 %v3320_v15, %v2400_v31  ;;  %v2399_v0 = vadd.f32 -0.28449672, %v2395_v58 }
 0xa69   : > { %v2434_v39 = vsub.f32 1.0, %v2430_v1  ;;  %v2429_v49 = vmul.f32 %v3326_v50, %v2409_v60  ;;  %v2596_v56 = vpop.permute.xlu1 %2595 }
 0xa6a   : > { %v2408_v40 = vadd.f32 0.2548296, %v2404_v62  ;;  %v2403_v34 = vmul.f32 %v3322_v52, %v2399_v0 }
 0xa6b   : > { %v2438_v55 = vmul.f32 %v2434_v39, %v2354_v14  ;;  %v2433_v38 = vsub.f32 1.0, %v2429_v49 }
 0xa6c   : > { %v2412_v30 = vmul.f32 %v3320_v15, %v2408_v40  ;;  %v2407_v36 = vadd.f32 0.2548296, %v2403_v34 }
 0xa6d   : > { %v2437_v21 = vmul.f32 %v2433_v38, %v2353_v57  ;;  %v2442_v20 = vadd.f32 1.0, %v2438_v55  ;;  %v2600_v24 = vpop.permute.xlu1 %2599 }
 0xa6e   : > { %v2432_v48 = vmul.f32 %v3328_v8, %v2412_v30  ;;  %v2411_v59 = vmul.f32 %v3322_v52, %v2407_v36 }
 0xa6f   : > { %v2441_v23 = vadd.f32 1.0, %v2437_v21  ;;  %v2446_v53 = vmul.f32 %v2442_v20, %v2342_v17 }
 0xa70   : > { %v2436_v5 = vsub.f32 1.0, %v2432_v48  ;;  %v2431_v15 = vmul.f32 %v3330_v4, %v2411_v59 }
 0xa71   : > { %v2445_v19 = vmul.f32 %v2441_v23, %v2341_v16 }
 0xa72   : > { %v2440_v51 = vmul.f32 %v2436_v5, %v2356_v43  ;;  %v2435_v42 = vsub.f32 1.0, %v2431_v15 }
 0xa73   : > { %3185 = vmatprep.mubr.msk.f32.mxu0 %vm529_vm3, %v2445_v19 }
 0xa74   : > { %v2439_v28 = vmul.f32 %v2435_v42, %v2355_v13  ;;  %3186 = vmatmul.mubr.msk.f32.vlgmr.msra.gmra.mxu0 %vm529_vm3, %v2446_v53  ;;  %v2444_v52 = vadd.f32 1.0, %v2440_v51 }
 0xa76   : > { %v2443_v7 = vadd.f32 1.0, %v2439_v28  ;;  %v2448_v9 = vmul.f32 %v2444_v52, %v2344_v22 }
 0xa78   : > { %v2447_v29 = vmul.f32 %v2443_v7, %v2343_v45 }
 0xa7a   : > { %3188 = vmatprep.mubr.msk.f32.mxu0 %vm529_vm3, %v2447_v29 }
 0xa7b   : > { %3189 = vmatmul.mubr.msk.f32.gmra.mxu0 %vm529_vm3, %v2448_v9 }
 0xb34   : > { %v3187_v2 = vpop.f32.mrf.mxu0 }
 0xb35   : > { %v2563_v44 = vmul.f32 %v3187_v2, %v2552_v27  ;;  %v2603_v47 = vmul.f32 %v3187_v2, %v2592_v46 }
 0xb36   : > { %v2527_v26 = vpop.f32.mrf.mxu0 }
 0xb37   : > { %v2562_v54 = vmul.f32 %v2548_v10, %v2527_v26  ;;  %2572 = vrot.lane.b32.xlu1 %v2563_v44, %s3413_s9  ;;  %v2602_v41 = vmul.f32 %v2588_v6, %v2527_v26 }
 0xb39   : > { %2570 = vrot.lane.b32.xlu0 %v2562_v54, %s3413_s9 }
 0xb3b   : > { %v3190_v3 = vpop.f32.mrf.mxu0  ;;  %2612 = vrot.lane.b32.xlu1 %v2603_v47, %s3414_s11 }
 0xb3c   : > { %v2565_v37 = vmul.f32 %v3190_v3, %v2560_v18  ;;  %v2605_v31 = vmul.f32 %v3190_v3, %v2600_v24 }
 0xb3d   : > { %v2537_v11 = vpop.f32.mrf.mxu0  ;;  %2610 = vrot.lane.b32.xlu0 %v2602_v41, %s3414_s11 }
 0xb3e   : > { %v2564_v33 = vmul.f32 %v2556_v35, %v2537_v11  ;;  %v2604_v1 = vmul.f32 %v2596_v56, %v2537_v11 }
 0xb3f   : > { %2576 = vrot.lane.b32.xlu1 %v2565_v37, %s3413_s9 }
 0xb41   : > { %2574 = vrot.lane.b32.xlu0 %v2564_v33, %s3413_s9 }
 0xb43   : > { %2616 = vrot.lane.b32.xlu1 %v2605_v31, %s3414_s11 }
 0xb45   : > { %2614 = vrot.lane.b32.xlu0 %v2604_v1, %s3414_s11 }
 0xba9   : > { %v2573_v58 = vpop.permute.xlu1 %2572 }
 0xbaa   : > { %v2583_v62 = vadd.f32 %v4274_v61, %v2573_v58 }
 0xbab   : > { %v2571_v60 = vpop.permute.xlu0 %2570 }
 0xbac   : > { %v2582_v39 = vadd.f32 %v4262_v25, %v2571_v60 }
 0xbad   : > { %v2613_v50 = vpop.permute.xlu1 %2612 }
 0xbae   : > { %v2623_v0 = vadd.f32 %v2613_v50, %v2583_v62 }
 0xbaf   : > { %v2611_v32 = vpop.permute.xlu0 %2610 }
 0xbb0   : > { %v2622_v14 = vadd.f32 %v2611_v32, %v2582_v39  ;;  %2632 = vrot.lane.b32.xlu1 %v2623_v0, %s3415_s12 }
 0xbb1   : > { %v2577_v49 = vpop.permute.xlu1 %2576 }
 0xbb2   : > { %2630 = vrot.lane.b32.xlu0 %v2622_v14, %s3415_s12  ;;  %v2585_v55 = vadd.f32 %v4288_v12, %v2577_v49 }
 0xbb3   : > { %v2575_v40 = vpop.permute.xlu0 %2574 }
 0xbb4   : > { %v2584_v38 = vadd.f32 %v4281_v63, %v2575_v40 }
 0xbb5   : > { %v2617_v34 = vpop.permute.xlu1 %2616 }
 0xbb6   : > { %v2625_v30 = vadd.f32 %v2617_v34, %v2585_v55 }
 0xbb7   : > { %v2615_v61 = vpop.permute.xlu0 %2614 }
 0xbb8   : > { %v2624_v8 = vadd.f32 %v2615_v61, %v2584_v38  ;;  %2636 = vrot.lane.b32.xlu1 %v2625_v30, %s3415_s12 }
 0xbba   : > { %2634 = vrot.lane.b32.xlu0 %v2624_v8, %s3415_s12 }
 0xc22   : > { %v2633_v25 = vpop.permute.xlu1 %2632 }
 0xc23   : > { %2643 = vst.msk [vmem:[%s236_s15 + $0x8] sm:$0xff] %vm529_vm3, %v2633_v25 }
 0xc24   : > { %v2631_v57 = vpop.permute.xlu0 %2630 }
 0xc25   : > { %2642 = vst.msk [vmem:[%s236_s15] sm:$0xff] %vm529_vm3, %v2631_v57 }
 0xc2a   : > { %v2637_v63 = vpop.permute.xlu1 %2636 }
 0xc2b   : > { %2645 = vst.msk [vmem:[%s236_s15 + $0x18] sm:$0xff] %vm529_vm3, %v2637_v63 }
 0xc2c   : > { %v2635_v12 = vpop.permute.xlu0 %2634 }
 0xc2d   : > { %2644 = vst.msk [vmem:[%s236_s15 + $0x10] sm:$0xff] %vm529_vm3, %v2635_v12 }
 0xc2e   : > { %3352 = shalt.err (!%p3349_p4)
}
 0xc2f   : > { %s3353_s10 = scalar_lea.hbm %s4386_s25, 512  ;;  %s3357_s12 = scalar_lea.hbm %s4434_s5, 1024 }
 0xc30   : > { %p3354_p7 = scmp.ne.s32.totalorder %s4386_s25, %s3353_s10  ;;  %p3358_p10 = scmp.lt.s32.totalorder %s4386_s25, %s4434_s5 }
 0xc31   : > { %p3359_p11 = scmp.lt.s32.totalorder %s3357_s12, %s3353_s10 }
 0xc32   : > { %p3355_p8 = pnand %p3354_p7, %p3487_p5 }
 0xc33   : > { %p3360_p12 = por %p3359_p11, %p3358_p10 }
 0xc34   : > { %p3356_p9 = pneg %p3355_p8 }
 0xc36   : > { %p3361_p13 = pnand %p3360_p12, %p3356_p9 }
 0xc38   : > { %3364 = shalt.err (!%p3361_p13)
}
 0xc39   : > { %s3417_s15 = smov 128   ;;  %s3418_s17 = smov 8  }
 0xc3a   : > { %3191 = dma.vmem_to_hbm [thread:$0]  (%p3487_p5), %s4380_s16, 512, %s4386_s25, %s4389_s26, %s3417_s15, %s3417_s15, %s3418_s17  }
 0xc3b PF: > { %p3197_p0 = scmp.ge.s32.totalorder %s3399_s21, 2  ;;  %s2675_s7 = sand.u32 1, %s3387_s18  }
 0xc3c   : > { %s2676_s23 = scalar_lea.sflag [#allocation3], %s2675_s7 }
 0xc3d   : > { %p3194_p1 = pnand %p3197_p0, %p3491_p6 }
 0xc3f   : > { %p3195_p2 = pneg %p3194_p1 }
 0xc41   : > { %3382 = dma.done.wait (%p3195_p2), %s2676_s23, 512  }
 0xc42   : > { %3384 = vsyncadd (%p3195_p2), %s2676_s23, 4294966784  ;;  %p15_p3 = scmp.ge.s32.totalorder %s3474_s24, 4   ;;  %s4467_s18 = smov %s3391_s19 }
 0xc43   : > { %s4468_s19 = smov %s3395_s20  ;;  %s4469_s20 = smov %s3485_s27 }
 0xc44   : > { %s4470_s21 = smov %s3474_s24  ;;  %17 = sbr.rel (!%p15_p3) target bundleno = 3 (0x3), region = 78 }
 0xc49   :  { %2681 = vsyncpa [#allocation3], 1 }
 0xc4a   :  { %2683 = vsyncpa [#allocation3 + $0x1], 1 }

</bundles_post_ra>
